<compile_context>
chip_gen: v7x
topology: tpu7x:2x2x1
jax: 0.10.0
libtpu: 0.0.40
codegen_flags: <defaults>
</compile_context>

<pallas_src>
import functools

import jax
import jax.numpy as jnp
import numpy as np
from jax.experimental import pallas as pl
from jax.experimental.pallas import tpu as pltpu


# ----------------------------- model config -----------------------------
LEN_VOC = 20
CHAR_EMBED_DIM = 8
SENT_EMBED_DIM = 8
PROBA_CNN_DIM = 8
CNN_DIM = 16
N_MODELS = 1
KERNEL_SIZE = 3          # only k=3 / 'same' implemented
BS = 4
T = 16                   # must be a multiple of 8 (sublane tile)
OUT_PAD = 128            # lane-dense logits slab width


# ------------------------------- kernel -------------------------------
def wavenet_kernel(tok_ref, sent_ref, probas_ref, m_nf_ref, m_nl_ref,
                   char_emb_ref, sent_emb_ref,
                   wp_ref, bp_ref,
                   w1c_ref, w1s_ref, w1p_ref, b1_ref,
                   w2_ref, b2_ref, w3_ref, b3_ref, w4_ref, b4_ref,
                   lw1_ref, lb1_ref, lw2_ref, lb2_ref,
                   out_ref):
    t = out_ref.shape[0]            # rows per grid step = one sample's T
    f32, bf16 = jnp.float32, jnp.bfloat16

    m_nf = m_nf_ref[...]            # (t,1): 1.0 everywhere except row 0
    m_nl = m_nl_ref[...]            # (t,1): 1.0 everywhere except row t-1

    def shift3(x):
        # x_prev[i] = x[i-1] (0 at i==0); x_next[i] = x[i+1] (0 at i==t-1).
        # XLU sublane rotation + VPU mask -- no MXU shift matrices.
        x_prev = pltpu.roll(x, 1, axis=0) * m_nf
        x_next = pltpu.roll(x, t - 1, axis=0) * m_nl
        return x_prev, x, x_next

    def conv3(taps, w_ref):
        # Conv1d(k=3,'same') as 3 accumulated matmuls (bf16 operands, f32 acc),
        # weight ref shaped (3, Cin, Cout) with tap order [prev, center, next].
        acc = jnp.dot(taps[0].astype(bf16), w_ref[0],
                      preferred_element_type=f32)
        acc += jnp.dot(taps[1].astype(bf16), w_ref[1],
                       preferred_element_type=f32)
        acc += jnp.dot(taps[2].astype(bf16), w_ref[2],
                       preferred_element_type=f32)
        return acc

    # Embedding lookups as one-hot matmuls (exact gathers, tables VMEM-resident).
    voc = char_emb_ref.shape[0]
    tok_oh = (tok_ref[...] ==
              jax.lax.broadcasted_iota(jnp.int32, (t, voc), 1)).astype(bf16)
    char_fts = jnp.dot(tok_oh, char_emb_ref[...], preferred_element_type=f32)

    nsent = sent_emb_ref.shape[0]
    sent_oh = (sent_ref[...] ==
               jax.lax.broadcasted_iota(jnp.int32, (t, nsent), 1)).astype(bf16)
    sent_fts = jnp.dot(sent_oh, sent_emb_ref[...], preferred_element_type=f32)

    # probas_cnn: ConvBlock(2*n_models -> proba_cnn_dim), use_bn=False.
    pf = jnp.maximum(conv3(shift3(probas_ref[...]), wp_ref) + bp_ref[...], 0.0)

    # cnn[0]: the [char|sent|probas] channel concat is replaced by summing the
    # three conv contributions against row-blocks of w1.  Sentiment features
    # are constant along time within a sample, so their shifted taps are just
    # boundary-masked copies (no roll needed).
    y = (conv3(shift3(char_fts), w1c_ref)
         + conv3((sent_fts * m_nf, sent_fts, sent_fts * m_nl), w1s_ref)
         + conv3(shift3(pf), w1p_ref)
         + b1_ref[...])
    x = jnp.maximum(y, 0.0)

    # cnn[1..3]
    x = jnp.maximum(conv3(shift3(x), w2_ref) + b2_ref[...], 0.0)
    x = jnp.maximum(conv3(shift3(x), w3_ref) + b3_ref[...], 0.0)
    x = jnp.maximum(conv3(shift3(x), w4_ref) + b4_ref[...], 0.0)

    # logits head: Linear(8cd, cd) + ReLU + Linear(cd, 2).  lw2/lb2 are zero
    # padded to 128 lanes so the final store is an unmasked, lane-dense vst.
    h = jnp.maximum(
        jnp.dot(x.astype(bf16), lw1_ref[...], preferred_element_type=f32)
        + lb1_ref[...], 0.0)
    out_ref[...] = (jnp.dot(h.astype(bf16), lw2_ref[...],
                            preferred_element_type=f32) + lb2_ref[...])


# ------------------------------- wrapper -------------------------------
def wavenet_forward(tokens, sentiment, start_probas, end_probas, params):
    """tokens: (bs,T) int32, sentiment: (bs,) int32,
    start/end_probas: (bs,T,n_models) float32."""
    bs, t = tokens.shape
    assert t % 8 == 0, "sequence length must be a multiple of 8 (sublane tile)"
    rows = bs * t
    nm = start_probas.shape[-1]
    bf16, f32 = jnp.bfloat16, jnp.float32

    # ---- trivial layout-only prep (reshapes / casts of small arrays) ----
    tok = tokens.reshape(rows, 1).astype(jnp.int32)
    sent = jnp.broadcast_to(sentiment[:, None], (bs, t)).reshape(rows, 1)
    sent = sent.astype(jnp.int32)
    probas = jnp.concatenate([start_probas, end_probas], axis=-1)
    probas = probas.reshape(rows, 2 * nm).astype(f32)

    # conv 'same' boundary masks, hoisted out of the kernel (static constants).
    pos = jnp.arange(t, dtype=jnp.int32)[:, None]
    m_nf = (pos != 0).astype(f32)          # zero at first row of a sample
    m_nl = (pos != t - 1).astype(f32)      # zero at last row of a sample

    # ---- weights: bf16 MXU operands; biases stay f32 ----
    # Conv weights are stored (3, Cin, Cout) with tap order [prev,center,next]
    # (torch Conv1d (Cout,Cin,3) weights must be permuted to this layout).
    char_emb = params["char_emb"].astype(bf16)
    sent_emb = params["sent_emb"].astype(bf16)
    wp = params["wp"].astype(bf16)
    w1 = params["w1"].astype(bf16)
    c0 = char_emb.shape[1]
    c1 = c0 + sent_emb.shape[1]
    w1c, w1s, w1p = w1[:, :c0, :], w1[:, c0:c1, :], w1[:, c1:, :]
    w2 = params["w2"].astype(bf16)
    w3 = params["w3"].astype(bf16)
    w4 = params["w4"].astype(bf16)
    lw1 = params["lw1"].astype(bf16)
    # lane-dense logits: pad (cd, 2) -> (cd, OUT_PAD), real logits in cols 0:2
    lw2p = jnp.zeros((params["lw2"].shape[0], OUT_PAD), bf16)
    lw2p = lw2p.at[:, :2].set(params["lw2"].astype(bf16))
    lb2p = jnp.zeros((1, OUT_PAD), f32).at[:, :2].set(params["lb2"])

    args = (tok, sent, probas, m_nf, m_nl,
            char_emb, sent_emb,
            wp, params["bp"],
            w1c, w1s, w1p, params["b1"],
            w2, params["b2"], w3, params["b3"], w4, params["b4"],
            lw1, params["lb1"], lw2p, lb2p)

    def row_spec(a):
        # One sample (T rows) per grid step.
        return pl.BlockSpec((t, a.shape[1]), lambda i: (i, 0))

    def const_spec(a):
        # Full array, constant block index -> stays VMEM-resident across steps.
        nd = a.ndim
        return pl.BlockSpec(a.shape, lambda i, _nd=nd: (0,) * _nd)

    in_specs = [row_spec(tok), row_spec(sent), row_spec(probas)]
    in_specs += [const_spec(a) for a in args[3:]]

    out = pl.pallas_call(
        wavenet_kernel,
        out_shape=jax.ShapeDtypeStruct((rows, OUT_PAD), f32),
        grid_spec=pltpu.PrefetchScalarGridSpec(
            num_scalar_prefetch=0,
            grid=(bs,),                         # one sample per grid step
            in_specs=in_specs,
            out_specs=pl.BlockSpec((t, OUT_PAD), lambda i: (i, 0)),
        ),
        compiler_params=pltpu.CompilerParams(
            dimension_semantics=("parallel",)),
    )(*args)

    logits = out[:, :2].reshape(bs, t, 2)
    return logits[:, :, 0], logits[:, :, 1]


# ----------------------- pure-JAX reference (check) -----------------------
def _ref_conv3_relu(x, w, b):
    z = jnp.zeros((x.shape[0], 1, x.shape[2]), x.dtype)
    x_prev = jnp.concatenate([z, x[:, :-1, :]], axis=1)
    x_next = jnp.concatenate([x[:, 1:, :], z], axis=1)
    y = (jnp.einsum("btc,cd->btd", x_prev, w[0])
         + jnp.einsum("btc,cd->btd", x, w[1])
         + jnp.einsum("btc,cd->btd", x_next, w[2]) + b)
    return jnp.maximum(y, 0.0)


def wavenet_reference(tokens, sentiment, start_probas, end_probas, params):
    bs, t = tokens.shape
    char_fts = params["char_emb"][tokens]
    sent_fts = jnp.broadcast_to(
        params["sent_emb"][sentiment][:, None, :], (bs, t, SENT_EMBED_DIM))
    probas = jnp.concatenate([start_probas, end_probas], axis=-1)
    pf = _ref_conv3_relu(probas, params["wp"], params["bp"])
    x = jnp.concatenate([char_fts, sent_fts, pf], axis=-1)
    x = _ref_conv3_relu(x, params["w1"], params["b1"])
    x = _ref_conv3_relu(x, params["w2"], params["b2"])
    x = _ref_conv3_relu(x, params["w3"], params["b3"])
    x = _ref_conv3_relu(x, params["w4"], params["b4"])
    h = jnp.maximum(jnp.einsum("btc,cd->btd", x, params["lw1"])
                    + params["lb1"], 0.0)
    logits = jnp.einsum("btc,cd->btd", h, params["lw2"]) + params["lb2"]
    return logits[:, :, 0], logits[:, :, 1]


# ----------------------------- param init -----------------------------
def init_params(key):
    ks = jax.random.split(key, 20)
    i = iter(range(20))

    def conv_w(k, cin, cout):
        # stored as (kernel=3, Cin, Cout), tap order [prev, center, next]
        return jax.random.normal(k, (3, cin, cout), jnp.float32) * 0.1

    def bias(k, c):
        return jax.random.normal(k, (1, c), jnp.float32) * 0.01

    cin0 = CHAR_EMBED_DIM + SENT_EMBED_DIM + PROBA_CNN_DIM
    p = {
        "char_emb": jax.random.normal(ks[next(i)], (LEN_VOC, CHAR_EMBED_DIM),
                                      jnp.float32) * 0.1,
        "sent_emb": jax.random.normal(ks[next(i)], (3, SENT_EMBED_DIM),
                                      jnp.float32) * 0.1,
        "wp": conv_w(ks[next(i)], N_MODELS * 2, PROBA_CNN_DIM),
        "bp": bias(ks[next(i)], PROBA_CNN_DIM),
        "w1": conv_w(ks[next(i)], cin0, CNN_DIM),
        "b1": bias(ks[next(i)], CNN_DIM),
        "w2": conv_w(ks[next(i)], CNN_DIM, CNN_DIM * 2),
        "b2": bias(ks[next(i)], CNN_DIM * 2),
        "w3": conv_w(ks[next(i)], CNN_DIM * 2, CNN_DIM * 4),
        "b3": bias(ks[next(i)], CNN_DIM * 4),
        "w4": conv_w(ks[next(i)], CNN_DIM * 4, CNN_DIM * 8),
        "b4": bias(ks[next(i)], CNN_DIM * 8),
        "lw1": jax.random.normal(ks[next(i)], (CNN_DIM * 8, CNN_DIM),
                                 jnp.float32) * 0.05,
        "lb1": bias(ks[next(i)], CNN_DIM),
        "lw2": jax.random.normal(ks[next(i)], (CNN_DIM, 2),
                                 jnp.float32) * 0.05,
        "lb2": bias(ks[next(i)], 2),
    }
    return p


if __name__ == "__main__":
    key = jax.random.PRNGKey(0)
    kp, kt, ks, ka, kb = jax.random.split(key, 5)

    params = init_params(kp)
    tokens = jax.random.randint(kt, (BS, T), 0, LEN_VOC, dtype=jnp.int32)
    sentiment = jax.random.randint(ks, (BS,), 0, 3, dtype=jnp.int32)
    start_probas = jax.nn.softmax(
        jax.random.normal(ka, (BS, T, N_MODELS), jnp.float32), axis=1)
    end_probas = jax.nn.softmax(
        jax.random.normal(kb, (BS, T, N_MODELS), jnp.float32), axis=1)

    fwd = jax.jit(functools.partial(wavenet_forward, params=params))
    start_logits, end_logits = fwd(tokens, sentiment, start_probas, end_probas)
    jax.block_until_ready((start_logits, end_logits))

    ref_start, ref_end = wavenet_reference(tokens, sentiment, start_probas,
                                           end_probas, params)
    assert start_logits.shape == (BS, T) and end_logits.shape == (BS, T)
    # Tolerances account for bf16 MXU operands (f32 accumulation) in-kernel
    # vs the pure-f32 reference.
    np.testing.assert_allclose(np.asarray(start_logits), np.asarray(ref_start),
                               rtol=2e-2, atol=2e-3)
    np.testing.assert_allclose(np.asarray(end_logits), np.asarray(ref_end),
                               rtol=2e-2, atol=2e-3)
    print("KERNEL_OK")
</pallas_src>

<mosaic_0001>
module attributes {stable_mosaic.version = 11 : i64} {
  func.func @wavenet_kernel(%arg0: i32, %arg1: memref<16x1xi32, #tpu.memory_space<vmem>>, %arg2: memref<16x1xi32, #tpu.memory_space<vmem>>, %arg3: memref<16x2xf32, #tpu.memory_space<vmem>>, %arg4: memref<16x1xf32, #tpu.memory_space<vmem>>, %arg5: memref<16x1xf32, #tpu.memory_space<vmem>>, %arg6: memref<20x8xbf16, #tpu.memory_space<vmem>>, %arg7: memref<3x8xbf16, #tpu.memory_space<vmem>>, %arg8: memref<3x2x8xbf16, #tpu.memory_space<vmem>>, %arg9: memref<1x8xf32, #tpu.memory_space<vmem>>, %arg10: memref<3x8x16xbf16, #tpu.memory_space<vmem>>, %arg11: memref<3x8x16xbf16, #tpu.memory_space<vmem>>, %arg12: memref<3x8x16xbf16, #tpu.memory_space<vmem>>, %arg13: memref<1x16xf32, #tpu.memory_space<vmem>>, %arg14: memref<3x16x32xbf16, #tpu.memory_space<vmem>>, %arg15: memref<1x32xf32, #tpu.memory_space<vmem>>, %arg16: memref<3x32x64xbf16, #tpu.memory_space<vmem>>, %arg17: memref<1x64xf32, #tpu.memory_space<vmem>>, %arg18: memref<3x64x128xbf16, #tpu.memory_space<vmem>>, %arg19: memref<1x128xf32, #tpu.memory_space<vmem>>, %arg20: memref<128x16xbf16, #tpu.memory_space<vmem>>, %arg21: memref<1x16xf32, #tpu.memory_space<vmem>>, %arg22: memref<16x128xbf16, #tpu.memory_space<vmem>>, %arg23: memref<1x128xf32, #tpu.memory_space<vmem>>, %arg24: memref<16x128xf32, #tpu.memory_space<vmem>>) attributes {dimension_semantics = [#tpu.dimension_semantics<parallel>], iteration_bounds = array<i64: 4>, scalar_prefetch = 0 : i64, scratch_operands = 0 : i64, tpu.core_type = #tpu.core_type<tc>, window_params = [{transform_indices = @transform_0, window_bounds = array<i64: 16, 1>}, {transform_indices = @transform_1, window_bounds = array<i64: 16, 1>}, {transform_indices = @transform_2, window_bounds = array<i64: 16, 2>}, {pipeline_mode = #tpu.pipeline_mode<synchronous>, transform_indices = @transform_3, window_bounds = array<i64: 16, 1>}, {pipeline_mode = #tpu.pipeline_mode<synchronous>, transform_indices = @transform_4, window_bounds = array<i64: 16, 1>}, {pipeline_mode = #tpu.pipeline_mode<synchronous>, transform_indices = @transform_5, window_bounds = array<i64: 20, 8>}, {pipeline_mode = #tpu.pipeline_mode<synchronous>, transform_indices = @transform_6, window_bounds = array<i64: 3, 8>}, {pipeline_mode = #tpu.pipeline_mode<synchronous>, transform_indices = @transform_7, window_bounds = array<i64: 3, 2, 8>}, {pipeline_mode = #tpu.pipeline_mode<synchronous>, transform_indices = @transform_8, window_bounds = array<i64: 1, 8>}, {pipeline_mode = #tpu.pipeline_mode<synchronous>, transform_indices = @transform_9, window_bounds = array<i64: 3, 8, 16>}, {pipeline_mode = #tpu.pipeline_mode<synchronous>, transform_indices = @transform_10, window_bounds = array<i64: 3, 8, 16>}, {pipeline_mode = #tpu.pipeline_mode<synchronous>, transform_indices = @transform_11, window_bounds = array<i64: 3, 8, 16>}, {pipeline_mode = #tpu.pipeline_mode<synchronous>, transform_indices = @transform_12, window_bounds = array<i64: 1, 16>}, {pipeline_mode = #tpu.pipeline_mode<synchronous>, transform_indices = @transform_13, window_bounds = array<i64: 3, 16, 32>}, {pipeline_mode = #tpu.pipeline_mode<synchronous>, transform_indices = @transform_14, window_bounds = array<i64: 1, 32>}, {pipeline_mode = #tpu.pipeline_mode<synchronous>, transform_indices = @transform_15, window_bounds = array<i64: 3, 32, 64>}, {pipeline_mode = #tpu.pipeline_mode<synchronous>, transform_indices = @transform_16, window_bounds = array<i64: 1, 64>}, {pipeline_mode = #tpu.pipeline_mode<synchronous>, transform_indices = @transform_17, window_bounds = array<i64: 3, 64, 128>}, {pipeline_mode = #tpu.pipeline_mode<synchronous>, transform_indices = @transform_18, window_bounds = array<i64: 1, 128>}, {pipeline_mode = #tpu.pipeline_mode<synchronous>, transform_indices = @transform_19, window_bounds = array<i64: 128, 16>}, {pipeline_mode = #tpu.pipeline_mode<synchronous>, transform_indices = @transform_20, window_bounds = array<i64: 1, 16>}, {pipeline_mode = #tpu.pipeline_mode<synchronous>, transform_indices = @transform_21, window_bounds = array<i64: 16, 128>}, {pipeline_mode = #tpu.pipeline_mode<synchronous>, transform_indices = @transform_22, window_bounds = array<i64: 1, 128>}, {transform_indices = @transform_23, window_bounds = array<i64: 16, 128>}]} {
    %c0 = arith.constant 0 : index
    %c0_0 = arith.constant 0 : index
    %0 = vector.load %arg4[%c0, %c0_0] : memref<16x1xf32, #tpu.memory_space<vmem>>, vector<16x1xf32>
    %c0_1 = arith.constant 0 : index
    %c0_2 = arith.constant 0 : index
    %1 = vector.load %arg5[%c0_1, %c0_2] : memref<16x1xf32, #tpu.memory_space<vmem>>, vector<16x1xf32>
    %c0_3 = arith.constant 0 : index
    %c0_4 = arith.constant 0 : index
    %2 = vector.load %arg1[%c0_3, %c0_4] : memref<16x1xi32, #tpu.memory_space<vmem>>, vector<16x1xi32>
    %3 = tpu.iota {dimensions = array<i32: 1>} : vector<16x20xi32>
    %4 = vector.broadcast %2 : vector<16x1xi32> to vector<16x20xi32>
    %5 = arith.cmpi eq, %4, %3 : vector<16x20xi32>
    %6 = arith.extui %5 : vector<16x20xi1> to vector<16x20xi32>
    %7 = arith.sitofp %6 : vector<16x20xi32> to vector<16x20xf32>
    %8 = arith.truncf %7 : vector<16x20xf32> to vector<16x20xbf16>
    %c0_5 = arith.constant 0 : index
    %c0_6 = arith.constant 0 : index
    %9 = vector.load %arg6[%c0_5, %c0_6] : memref<20x8xbf16, #tpu.memory_space<vmem>>, vector<20x8xbf16>
    %cst = arith.constant dense<0.000000e+00> : vector<16x8xf32>
    %10 = tpu.matmul %8, %9, %cst {dimension_numbers = #tpu.dot_dimension_numbers<[1], [0], [0], [1], [0, 0, 1, 1], [], []>} : vector<16x20xbf16>, vector<20x8xbf16>, vector<16x8xf32> -> vector<16x8xf32>
    %c0_7 = arith.constant 0 : index
    %c0_8 = arith.constant 0 : index
    %11 = vector.load %arg2[%c0_7, %c0_8] : memref<16x1xi32, #tpu.memory_space<vmem>>, vector<16x1xi32>
    %12 = tpu.iota {dimensions = array<i32: 1>} : vector<16x3xi32>
    %13 = vector.broadcast %11 : vector<16x1xi32> to vector<16x3xi32>
    %14 = arith.cmpi eq, %13, %12 : vector<16x3xi32>
    %15 = arith.extui %14 : vector<16x3xi1> to vector<16x3xi32>
    %16 = arith.sitofp %15 : vector<16x3xi32> to vector<16x3xf32>
    %17 = arith.truncf %16 : vector<16x3xf32> to vector<16x3xbf16>
    %c0_9 = arith.constant 0 : index
    %c0_10 = arith.constant 0 : index
    %18 = vector.load %arg7[%c0_9, %c0_10] : memref<3x8xbf16, #tpu.memory_space<vmem>>, vector<3x8xbf16>
    %cst_11 = arith.constant dense<0.000000e+00> : vector<16x8xf32>
    %19 = tpu.matmul %17, %18, %cst_11 {dimension_numbers = #tpu.dot_dimension_numbers<[1], [0], [0], [1], [0, 0, 1, 1], [], []>} : vector<16x3xbf16>, vector<3x8xbf16>, vector<16x8xf32> -> vector<16x8xf32>
    %c0_12 = arith.constant 0 : index
    %c0_13 = arith.constant 0 : index
    %20 = vector.load %arg3[%c0_12, %c0_13] : memref<16x2xf32, #tpu.memory_space<vmem>>, vector<16x2xf32>
    %c1_i32 = arith.constant 1 : i32
    %21 = tpu.dynamic_rotate %20 by %c1_i32 dim 0 : vector<16x2xf32>, i32 -> vector<16x2xf32>
    %22 = vector.broadcast %0 : vector<16x1xf32> to vector<16x2xf32>
    %23 = arith.mulf %21, %22 : vector<16x2xf32>
    %c15_i32 = arith.constant 15 : i32
    %24 = tpu.dynamic_rotate %20 by %c15_i32 dim 0 : vector<16x2xf32>, i32 -> vector<16x2xf32>
    %25 = vector.broadcast %1 : vector<16x1xf32> to vector<16x2xf32>
    %26 = arith.mulf %24, %25 : vector<16x2xf32>
    %27 = arith.truncf %23 : vector<16x2xf32> to vector<16x2xbf16>
    %c0_14 = arith.constant 0 : index
    %c0_15 = arith.constant 0 : index
    %c0_16 = arith.constant 0 : index
    %28 = vector.load %arg8[%c0_14, %c0_15, %c0_16] : memref<3x2x8xbf16, #tpu.memory_space<vmem>>, vector<1x2x8xbf16>
    %29 = vector.shape_cast %28 : vector<1x2x8xbf16> to vector<2x8xbf16>
    %cst_17 = arith.constant dense<0.000000e+00> : vector<16x8xf32>
    %30 = tpu.matmul %27, %29, %cst_17 {dimension_numbers = #tpu.dot_dimension_numbers<[1], [0], [0], [1], [0, 0, 1, 1], [], []>} : vector<16x2xbf16>, vector<2x8xbf16>, vector<16x8xf32> -> vector<16x8xf32>
    %31 = arith.truncf %20 : vector<16x2xf32> to vector<16x2xbf16>
    %c1 = arith.constant 1 : index
    %c0_18 = arith.constant 0 : index
    %c0_19 = arith.constant 0 : index
    %32 = vector.load %arg8[%c1, %c0_18, %c0_19] : memref<3x2x8xbf16, #tpu.memory_space<vmem>>, vector<1x2x8xbf16>
    %33 = vector.shape_cast %32 : vector<1x2x8xbf16> to vector<2x8xbf16>
    %cst_20 = arith.constant dense<0.000000e+00> : vector<16x8xf32>
    %34 = tpu.matmul %31, %33, %cst_20 {dimension_numbers = #tpu.dot_dimension_numbers<[1], [0], [0], [1], [0, 0, 1, 1], [], []>} : vector<16x2xbf16>, vector<2x8xbf16>, vector<16x8xf32> -> vector<16x8xf32>
    %35 = arith.addf %30, %34 : vector<16x8xf32>
    %36 = arith.truncf %26 : vector<16x2xf32> to vector<16x2xbf16>
    %c2 = arith.constant 2 : index
    %c0_21 = arith.constant 0 : index
    %c0_22 = arith.constant 0 : index
    %37 = vector.load %arg8[%c2, %c0_21, %c0_22] : memref<3x2x8xbf16, #tpu.memory_space<vmem>>, vector<1x2x8xbf16>
    %38 = vector.shape_cast %37 : vector<1x2x8xbf16> to vector<2x8xbf16>
    %cst_23 = arith.constant dense<0.000000e+00> : vector<16x8xf32>
    %39 = tpu.matmul %36, %38, %cst_23 {dimension_numbers = #tpu.dot_dimension_numbers<[1], [0], [0], [1], [0, 0, 1, 1], [], []>} : vector<16x2xbf16>, vector<2x8xbf16>, vector<16x8xf32> -> vector<16x8xf32>
    %40 = arith.addf %35, %39 : vector<16x8xf32>
    %c0_24 = arith.constant 0 : index
    %c0_25 = arith.constant 0 : index
    %41 = vector.load %arg9[%c0_24, %c0_25] : memref<1x8xf32, #tpu.memory_space<vmem>>, vector<1x8xf32>
    %42 = vector.broadcast %41 : vector<1x8xf32> to vector<16x8xf32>
    %43 = arith.addf %40, %42 : vector<16x8xf32>
    %cst_26 = arith.constant 0.000000e+00 : f32
    %44 = vector.broadcast %cst_26 : f32 to vector<16x8xf32>
    %45 = arith.maximumf %43, %44 : vector<16x8xf32>
    %c1_i32_27 = arith.constant 1 : i32
    %46 = tpu.dynamic_rotate %10 by %c1_i32_27 dim 0 : vector<16x8xf32>, i32 -> vector<16x8xf32>
    %47 = vector.broadcast %0 : vector<16x1xf32> to vector<16x8xf32>
    %48 = arith.mulf %46, %47 : vector<16x8xf32>
    %c15_i32_28 = arith.constant 15 : i32
    %49 = tpu.dynamic_rotate %10 by %c15_i32_28 dim 0 : vector<16x8xf32>, i32 -> vector<16x8xf32>
    %50 = vector.broadcast %1 : vector<16x1xf32> to vector<16x8xf32>
    %51 = arith.mulf %49, %50 : vector<16x8xf32>
    %52 = arith.truncf %48 : vector<16x8xf32> to vector<16x8xbf16>
    %c0_29 = arith.constant 0 : index
    %c0_30 = arith.constant 0 : index
    %c0_31 = arith.constant 0 : index
    %53 = vector.load %arg10[%c0_29, %c0_30, %c0_31] : memref<3x8x16xbf16, #tpu.memory_space<vmem>>, vector<1x8x16xbf16>
    %54 = vector.shape_cast %53 : vector<1x8x16xbf16> to vector<8x16xbf16>
    %cst_32 = arith.constant dense<0.000000e+00> : vector<16x16xf32>
    %55 = tpu.matmul %52, %54, %cst_32 {dimension_numbers = #tpu.dot_dimension_numbers<[1], [0], [0], [1], [0, 0, 1, 1], [], []>} : vector<16x8xbf16>, vector<8x16xbf16>, vector<16x16xf32> -> vector<16x16xf32>
    %56 = arith.truncf %10 : vector<16x8xf32> to vector<16x8xbf16>
    %c1_33 = arith.constant 1 : index
    %c0_34 = arith.constant 0 : index
    %c0_35 = arith.constant 0 : index
    %57 = vector.load %arg10[%c1_33, %c0_34, %c0_35] : memref<3x8x16xbf16, #tpu.memory_space<vmem>>, vector<1x8x16xbf16>
    %58 = vector.shape_cast %57 : vector<1x8x16xbf16> to vector<8x16xbf16>
    %cst_36 = arith.constant dense<0.000000e+00> : vector<16x16xf32>
    %59 = tpu.matmul %56, %58, %cst_36 {dimension_numbers = #tpu.dot_dimension_numbers<[1], [0], [0], [1], [0, 0, 1, 1], [], []>} : vector<16x8xbf16>, vector<8x16xbf16>, vector<16x16xf32> -> vector<16x16xf32>
    %60 = arith.addf %55, %59 : vector<16x16xf32>
    %61 = arith.truncf %51 : vector<16x8xf32> to vector<16x8xbf16>
    %c2_37 = arith.constant 2 : index
    %c0_38 = arith.constant 0 : index
    %c0_39 = arith.constant 0 : index
    %62 = vector.load %arg10[%c2_37, %c0_38, %c0_39] : memref<3x8x16xbf16, #tpu.memory_space<vmem>>, vector<1x8x16xbf16>
    %63 = vector.shape_cast %62 : vector<1x8x16xbf16> to vector<8x16xbf16>
    %cst_40 = arith.constant dense<0.000000e+00> : vector<16x16xf32>
    %64 = tpu.matmul %61, %63, %cst_40 {dimension_numbers = #tpu.dot_dimension_numbers<[1], [0], [0], [1], [0, 0, 1, 1], [], []>} : vector<16x8xbf16>, vector<8x16xbf16>, vector<16x16xf32> -> vector<16x16xf32>
    %65 = arith.addf %60, %64 : vector<16x16xf32>
    %66 = vector.broadcast %0 : vector<16x1xf32> to vector<16x8xf32>
    %67 = arith.mulf %19, %66 : vector<16x8xf32>
    %68 = vector.broadcast %1 : vector<16x1xf32> to vector<16x8xf32>
    %69 = arith.mulf %19, %68 : vector<16x8xf32>
    %70 = arith.truncf %67 : vector<16x8xf32> to vector<16x8xbf16>
    %c0_41 = arith.constant 0 : index
    %c0_42 = arith.constant 0 : index
    %c0_43 = arith.constant 0 : index
    %71 = vector.load %arg11[%c0_41, %c0_42, %c0_43] : memref<3x8x16xbf16, #tpu.memory_space<vmem>>, vector<1x8x16xbf16>
    %72 = vector.shape_cast %71 : vector<1x8x16xbf16> to vector<8x16xbf16>
    %cst_44 = arith.constant dense<0.000000e+00> : vector<16x16xf32>
    %73 = tpu.matmul %70, %72, %cst_44 {dimension_numbers = #tpu.dot_dimension_numbers<[1], [0], [0], [1], [0, 0, 1, 1], [], []>} : vector<16x8xbf16>, vector<8x16xbf16>, vector<16x16xf32> -> vector<16x16xf32>
    %74 = arith.truncf %19 : vector<16x8xf32> to vector<16x8xbf16>
    %c1_45 = arith.constant 1 : index
    %c0_46 = arith.constant 0 : index
    %c0_47 = arith.constant 0 : index
    %75 = vector.load %arg11[%c1_45, %c0_46, %c0_47] : memref<3x8x16xbf16, #tpu.memory_space<vmem>>, vector<1x8x16xbf16>
    %76 = vector.shape_cast %75 : vector<1x8x16xbf16> to vector<8x16xbf16>
    %cst_48 = arith.constant dense<0.000000e+00> : vector<16x16xf32>
    %77 = tpu.matmul %74, %76, %cst_48 {dimension_numbers = #tpu.dot_dimension_numbers<[1], [0], [0], [1], [0, 0, 1, 1], [], []>} : vector<16x8xbf16>, vector<8x16xbf16>, vector<16x16xf32> -> vector<16x16xf32>
    %78 = arith.addf %73, %77 : vector<16x16xf32>
    %79 = arith.truncf %69 : vector<16x8xf32> to vector<16x8xbf16>
    %c2_49 = arith.constant 2 : index
    %c0_50 = arith.constant 0 : index
    %c0_51 = arith.constant 0 : index
    %80 = vector.load %arg11[%c2_49, %c0_50, %c0_51] : memref<3x8x16xbf16, #tpu.memory_space<vmem>>, vector<1x8x16xbf16>
    %81 = vector.shape_cast %80 : vector<1x8x16xbf16> to vector<8x16xbf16>
    %cst_52 = arith.constant dense<0.000000e+00> : vector<16x16xf32>
    %82 = tpu.matmul %79, %81, %cst_52 {dimension_numbers = #tpu.dot_dimension_numbers<[1], [0], [0], [1], [0, 0, 1, 1], [], []>} : vector<16x8xbf16>, vector<8x16xbf16>, vector<16x16xf32> -> vector<16x16xf32>
    %83 = arith.addf %78, %82 : vector<16x16xf32>
    %84 = arith.addf %65, %83 : vector<16x16xf32>
    %c1_i32_53 = arith.constant 1 : i32
    %85 = tpu.dynamic_rotate %45 by %c1_i32_53 dim 0 : vector<16x8xf32>, i32 -> vector<16x8xf32>
    %86 = vector.broadcast %0 : vector<16x1xf32> to vector<16x8xf32>
    %87 = arith.mulf %85, %86 : vector<16x8xf32>
    %c15_i32_54 = arith.constant 15 : i32
    %88 = tpu.dynamic_rotate %45 by %c15_i32_54 dim 0 : vector<16x8xf32>, i32 -> vector<16x8xf32>
    %89 = vector.broadcast %1 : vector<16x1xf32> to vector<16x8xf32>
    %90 = arith.mulf %88, %89 : vector<16x8xf32>
    %91 = arith.truncf %87 : vector<16x8xf32> to vector<16x8xbf16>
    %c0_55 = arith.constant 0 : index
    %c0_56 = arith.constant 0 : index
    %c0_57 = arith.constant 0 : index
    %92 = vector.load %arg12[%c0_55, %c0_56, %c0_57] : memref<3x8x16xbf16, #tpu.memory_space<vmem>>, vector<1x8x16xbf16>
    %93 = vector.shape_cast %92 : vector<1x8x16xbf16> to vector<8x16xbf16>
    %cst_58 = arith.constant dense<0.000000e+00> : vector<16x16xf32>
    %94 = tpu.matmul %91, %93, %cst_58 {dimension_numbers = #tpu.dot_dimension_numbers<[1], [0], [0], [1], [0, 0, 1, 1], [], []>} : vector<16x8xbf16>, vector<8x16xbf16>, vector<16x16xf32> -> vector<16x16xf32>
    %95 = arith.truncf %45 : vector<16x8xf32> to vector<16x8xbf16>
    %c1_59 = arith.constant 1 : index
    %c0_60 = arith.constant 0 : index
    %c0_61 = arith.constant 0 : index
    %96 = vector.load %arg12[%c1_59, %c0_60, %c0_61] : memref<3x8x16xbf16, #tpu.memory_space<vmem>>, vector<1x8x16xbf16>
    %97 = vector.shape_cast %96 : vector<1x8x16xbf16> to vector<8x16xbf16>
    %cst_62 = arith.constant dense<0.000000e+00> : vector<16x16xf32>
    %98 = tpu.matmul %95, %97, %cst_62 {dimension_numbers = #tpu.dot_dimension_numbers<[1], [0], [0], [1], [0, 0, 1, 1], [], []>} : vector<16x8xbf16>, vector<8x16xbf16>, vector<16x16xf32> -> vector<16x16xf32>
    %99 = arith.addf %94, %98 : vector<16x16xf32>
    %100 = arith.truncf %90 : vector<16x8xf32> to vector<16x8xbf16>
    %c2_63 = arith.constant 2 : index
    %c0_64 = arith.constant 0 : index
    %c0_65 = arith.constant 0 : index
    %101 = vector.load %arg12[%c2_63, %c0_64, %c0_65] : memref<3x8x16xbf16, #tpu.memory_space<vmem>>, vector<1x8x16xbf16>
    %102 = vector.shape_cast %101 : vector<1x8x16xbf16> to vector<8x16xbf16>
    %cst_66 = arith.constant dense<0.000000e+00> : vector<16x16xf32>
    %103 = tpu.matmul %100, %102, %cst_66 {dimension_numbers = #tpu.dot_dimension_numbers<[1], [0], [0], [1], [0, 0, 1, 1], [], []>} : vector<16x8xbf16>, vector<8x16xbf16>, vector<16x16xf32> -> vector<16x16xf32>
    %104 = arith.addf %99, %103 : vector<16x16xf32>
    %105 = arith.addf %84, %104 : vector<16x16xf32>
    %c0_67 = arith.constant 0 : index
    %c0_68 = arith.constant 0 : index
    %106 = vector.load %arg13[%c0_67, %c0_68] : memref<1x16xf32, #tpu.memory_space<vmem>>, vector<1x16xf32>
    %107 = vector.broadcast %106 : vector<1x16xf32> to vector<16x16xf32>
    %108 = arith.addf %105, %107 : vector<16x16xf32>
    %cst_69 = arith.constant 0.000000e+00 : f32
    %109 = vector.broadcast %cst_69 : f32 to vector<16x16xf32>
    %110 = arith.maximumf %108, %109 : vector<16x16xf32>
    %c1_i32_70 = arith.constant 1 : i32
    %111 = tpu.dynamic_rotate %110 by %c1_i32_70 dim 0 : vector<16x16xf32>, i32 -> vector<16x16xf32>
    %112 = vector.broadcast %0 : vector<16x1xf32> to vector<16x16xf32>
    %113 = arith.mulf %111, %112 : vector<16x16xf32>
    %c15_i32_71 = arith.constant 15 : i32
    %114 = tpu.dynamic_rotate %110 by %c15_i32_71 dim 0 : vector<16x16xf32>, i32 -> vector<16x16xf32>
    %115 = vector.broadcast %1 : vector<16x1xf32> to vector<16x16xf32>
    %116 = arith.mulf %114, %115 : vector<16x16xf32>
    %117 = arith.truncf %113 : vector<16x16xf32> to vector<16x16xbf16>
    %c0_72 = arith.constant 0 : index
    %c0_73 = arith.constant 0 : index
    %c0_74 = arith.constant 0 : index
    %118 = vector.load %arg14[%c0_72, %c0_73, %c0_74] : memref<3x16x32xbf16, #tpu.memory_space<vmem>>, vector<1x16x32xbf16>
    %119 = vector.shape_cast %118 : vector<1x16x32xbf16> to vector<16x32xbf16>
    %cst_75 = arith.constant dense<0.000000e+00> : vector<16x32xf32>
    %120 = tpu.matmul %117, %119, %cst_75 {dimension_numbers = #tpu.dot_dimension_numbers<[1], [0], [0], [1], [0, 0, 1, 1], [], []>} : vector<16x16xbf16>, vector<16x32xbf16>, vector<16x32xf32> -> vector<16x32xf32>
    %121 = arith.truncf %110 : vector<16x16xf32> to vector<16x16xbf16>
    %c1_76 = arith.constant 1 : index
    %c0_77 = arith.constant 0 : index
    %c0_78 = arith.constant 0 : index
    %122 = vector.load %arg14[%c1_76, %c0_77, %c0_78] : memref<3x16x32xbf16, #tpu.memory_space<vmem>>, vector<1x16x32xbf16>
    %123 = vector.shape_cast %122 : vector<1x16x32xbf16> to vector<16x32xbf16>
    %cst_79 = arith.constant dense<0.000000e+00> : vector<16x32xf32>
    %124 = tpu.matmul %121, %123, %cst_79 {dimension_numbers = #tpu.dot_dimension_numbers<[1], [0], [0], [1], [0, 0, 1, 1], [], []>} : vector<16x16xbf16>, vector<16x32xbf16>, vector<16x32xf32> -> vector<16x32xf32>
    %125 = arith.addf %120, %124 : vector<16x32xf32>
    %126 = arith.truncf %116 : vector<16x16xf32> to vector<16x16xbf16>
    %c2_80 = arith.constant 2 : index
    %c0_81 = arith.constant 0 : index
    %c0_82 = arith.constant 0 : index
    %127 = vector.load %arg14[%c2_80, %c0_81, %c0_82] : memref<3x16x32xbf16, #tpu.memory_space<vmem>>, vector<1x16x32xbf16>
    %128 = vector.shape_cast %127 : vector<1x16x32xbf16> to vector<16x32xbf16>
    %cst_83 = arith.constant dense<0.000000e+00> : vector<16x32xf32>
    %129 = tpu.matmul %126, %128, %cst_83 {dimension_numbers = #tpu.dot_dimension_numbers<[1], [0], [0], [1], [0, 0, 1, 1], [], []>} : vector<16x16xbf16>, vector<16x32xbf16>, vector<16x32xf32> -> vector<16x32xf32>
    %130 = arith.addf %125, %129 : vector<16x32xf32>
    %c0_84 = arith.constant 0 : index
    %c0_85 = arith.constant 0 : index
    %131 = vector.load %arg15[%c0_84, %c0_85] : memref<1x32xf32, #tpu.memory_space<vmem>>, vector<1x32xf32>
    %132 = vector.broadcast %131 : vector<1x32xf32> to vector<16x32xf32>
    %133 = arith.addf %130, %132 : vector<16x32xf32>
    %cst_86 = arith.constant 0.000000e+00 : f32
    %134 = vector.broadcast %cst_86 : f32 to vector<16x32xf32>
    %135 = arith.maximumf %133, %134 : vector<16x32xf32>
    %c1_i32_87 = arith.constant 1 : i32
    %136 = tpu.dynamic_rotate %135 by %c1_i32_87 dim 0 : vector<16x32xf32>, i32 -> vector<16x32xf32>
    %137 = vector.broadcast %0 : vector<16x1xf32> to vector<16x32xf32>
    %138 = arith.mulf %136, %137 : vector<16x32xf32>
    %c15_i32_88 = arith.constant 15 : i32
    %139 = tpu.dynamic_rotate %135 by %c15_i32_88 dim 0 : vector<16x32xf32>, i32 -> vector<16x32xf32>
    %140 = vector.broadcast %1 : vector<16x1xf32> to vector<16x32xf32>
    %141 = arith.mulf %139, %140 : vector<16x32xf32>
    %142 = arith.truncf %138 : vector<16x32xf32> to vector<16x32xbf16>
    %c0_89 = arith.constant 0 : index
    %c0_90 = arith.constant 0 : index
    %c0_91 = arith.constant 0 : index
    %143 = vector.load %arg16[%c0_89, %c0_90, %c0_91] : memref<3x32x64xbf16, #tpu.memory_space<vmem>>, vector<1x32x64xbf16>
    %144 = vector.shape_cast %143 : vector<1x32x64xbf16> to vector<32x64xbf16>
    %cst_92 = arith.constant dense<0.000000e+00> : vector<16x64xf32>
    %145 = tpu.matmul %142, %144, %cst_92 {dimension_numbers = #tpu.dot_dimension_numbers<[1], [0], [0], [1], [0, 0, 1, 1], [], []>} : vector<16x32xbf16>, vector<32x64xbf16>, vector<16x64xf32> -> vector<16x64xf32>
    %146 = arith.truncf %135 : vector<16x32xf32> to vector<16x32xbf16>
    %c1_93 = arith.constant 1 : index
    %c0_94 = arith.constant 0 : index
    %c0_95 = arith.constant 0 : index
    %147 = vector.load %arg16[%c1_93, %c0_94, %c0_95] : memref<3x32x64xbf16, #tpu.memory_space<vmem>>, vector<1x32x64xbf16>
    %148 = vector.shape_cast %147 : vector<1x32x64xbf16> to vector<32x64xbf16>
    %cst_96 = arith.constant dense<0.000000e+00> : vector<16x64xf32>
    %149 = tpu.matmul %146, %148, %cst_96 {dimension_numbers = #tpu.dot_dimension_numbers<[1], [0], [0], [1], [0, 0, 1, 1], [], []>} : vector<16x32xbf16>, vector<32x64xbf16>, vector<16x64xf32> -> vector<16x64xf32>
    %150 = arith.addf %145, %149 : vector<16x64xf32>
    %151 = arith.truncf %141 : vector<16x32xf32> to vector<16x32xbf16>
    %c2_97 = arith.constant 2 : index
    %c0_98 = arith.constant 0 : index
    %c0_99 = arith.constant 0 : index
    %152 = vector.load %arg16[%c2_97, %c0_98, %c0_99] : memref<3x32x64xbf16, #tpu.memory_space<vmem>>, vector<1x32x64xbf16>
    %153 = vector.shape_cast %152 : vector<1x32x64xbf16> to vector<32x64xbf16>
    %cst_100 = arith.constant dense<0.000000e+00> : vector<16x64xf32>
    %154 = tpu.matmul %151, %153, %cst_100 {dimension_numbers = #tpu.dot_dimension_numbers<[1], [0], [0], [1], [0, 0, 1, 1], [], []>} : vector<16x32xbf16>, vector<32x64xbf16>, vector<16x64xf32> -> vector<16x64xf32>
    %155 = arith.addf %150, %154 : vector<16x64xf32>
    %c0_101 = arith.constant 0 : index
    %c0_102 = arith.constant 0 : index
    %156 = vector.load %arg17[%c0_101, %c0_102] : memref<1x64xf32, #tpu.memory_space<vmem>>, vector<1x64xf32>
    %157 = vector.broadcast %156 : vector<1x64xf32> to vector<16x64xf32>
    %158 = arith.addf %155, %157 : vector<16x64xf32>
    %cst_103 = arith.constant 0.000000e+00 : f32
    %159 = vector.broadcast %cst_103 : f32 to vector<16x64xf32>
    %160 = arith.maximumf %158, %159 : vector<16x64xf32>
    %c1_i32_104 = arith.constant 1 : i32
    %161 = tpu.dynamic_rotate %160 by %c1_i32_104 dim 0 : vector<16x64xf32>, i32 -> vector<16x64xf32>
    %162 = vector.broadcast %0 : vector<16x1xf32> to vector<16x64xf32>
    %163 = arith.mulf %161, %162 : vector<16x64xf32>
    %c15_i32_105 = arith.constant 15 : i32
    %164 = tpu.dynamic_rotate %160 by %c15_i32_105 dim 0 : vector<16x64xf32>, i32 -> vector<16x64xf32>
    %165 = vector.broadcast %1 : vector<16x1xf32> to vector<16x64xf32>
    %166 = arith.mulf %164, %165 : vector<16x64xf32>
    %167 = arith.truncf %163 : vector<16x64xf32> to vector<16x64xbf16>
    %c0_106 = arith.constant 0 : index
    %c0_107 = arith.constant 0 : index
    %c0_108 = arith.constant 0 : index
    %168 = vector.load %arg18[%c0_106, %c0_107, %c0_108] : memref<3x64x128xbf16, #tpu.memory_space<vmem>>, vector<1x64x128xbf16>
    %169 = vector.shape_cast %168 : vector<1x64x128xbf16> to vector<64x128xbf16>
    %cst_109 = arith.constant dense<0.000000e+00> : vector<16x128xf32>
    %170 = tpu.matmul %167, %169, %cst_109 {dimension_numbers = #tpu.dot_dimension_numbers<[1], [0], [0], [1], [0, 0, 1, 1], [], []>} : vector<16x64xbf16>, vector<64x128xbf16>, vector<16x128xf32> -> vector<16x128xf32>
    %171 = arith.truncf %160 : vector<16x64xf32> to vector<16x64xbf16>
    %c1_110 = arith.constant 1 : index
    %c0_111 = arith.constant 0 : index
    %c0_112 = arith.constant 0 : index
    %172 = vector.load %arg18[%c1_110, %c0_111, %c0_112] : memref<3x64x128xbf16, #tpu.memory_space<vmem>>, vector<1x64x128xbf16>
    %173 = vector.shape_cast %172 : vector<1x64x128xbf16> to vector<64x128xbf16>
    %cst_113 = arith.constant dense<0.000000e+00> : vector<16x128xf32>
    %174 = tpu.matmul %171, %173, %cst_113 {dimension_numbers = #tpu.dot_dimension_numbers<[1], [0], [0], [1], [0, 0, 1, 1], [], []>} : vector<16x64xbf16>, vector<64x128xbf16>, vector<16x128xf32> -> vector<16x128xf32>
    %175 = arith.addf %170, %174 : vector<16x128xf32>
    %176 = arith.truncf %166 : vector<16x64xf32> to vector<16x64xbf16>
    %c2_114 = arith.constant 2 : index
    %c0_115 = arith.constant 0 : index
    %c0_116 = arith.constant 0 : index
    %177 = vector.load %arg18[%c2_114, %c0_115, %c0_116] : memref<3x64x128xbf16, #tpu.memory_space<vmem>>, vector<1x64x128xbf16>
    %178 = vector.shape_cast %177 : vector<1x64x128xbf16> to vector<64x128xbf16>
    %cst_117 = arith.constant dense<0.000000e+00> : vector<16x128xf32>
    %179 = tpu.matmul %176, %178, %cst_117 {dimension_numbers = #tpu.dot_dimension_numbers<[1], [0], [0], [1], [0, 0, 1, 1], [], []>} : vector<16x64xbf16>, vector<64x128xbf16>, vector<16x128xf32> -> vector<16x128xf32>
    %180 = arith.addf %175, %179 : vector<16x128xf32>
    %c0_118 = arith.constant 0 : index
    %c0_119 = arith.constant 0 : index
    %181 = vector.load %arg19[%c0_118, %c0_119] : memref<1x128xf32, #tpu.memory_space<vmem>>, vector<1x128xf32>
    %182 = vector.broadcast %181 : vector<1x128xf32> to vector<16x128xf32>
    %183 = arith.addf %180, %182 : vector<16x128xf32>
    %cst_120 = arith.constant 0.000000e+00 : f32
    %184 = vector.broadcast %cst_120 : f32 to vector<16x128xf32>
    %185 = arith.maximumf %183, %184 : vector<16x128xf32>
    %186 = arith.truncf %185 : vector<16x128xf32> to vector<16x128xbf16>
    %c0_121 = arith.constant 0 : index
    %c0_122 = arith.constant 0 : index
    %187 = vector.load %arg20[%c0_121, %c0_122] : memref<128x16xbf16, #tpu.memory_space<vmem>>, vector<128x16xbf16>
    %cst_123 = arith.constant dense<0.000000e+00> : vector<16x16xf32>
    %188 = tpu.matmul %186, %187, %cst_123 {dimension_numbers = #tpu.dot_dimension_numbers<[1], [0], [0], [1], [0, 0, 1, 1], [], []>} : vector<16x128xbf16>, vector<128x16xbf16>, vector<16x16xf32> -> vector<16x16xf32>
    %c0_124 = arith.constant 0 : index
    %c0_125 = arith.constant 0 : index
    %189 = vector.load %arg21[%c0_124, %c0_125] : memref<1x16xf32, #tpu.memory_space<vmem>>, vector<1x16xf32>
    %190 = vector.broadcast %189 : vector<1x16xf32> to vector<16x16xf32>
    %191 = arith.addf %188, %190 : vector<16x16xf32>
    %cst_126 = arith.constant 0.000000e+00 : f32
    %192 = vector.broadcast %cst_126 : f32 to vector<16x16xf32>
    %193 = arith.maximumf %191, %192 : vector<16x16xf32>
    %194 = arith.truncf %193 : vector<16x16xf32> to vector<16x16xbf16>
    %c0_127 = arith.constant 0 : index
    %c0_128 = arith.constant 0 : index
    %195 = vector.load %arg22[%c0_127, %c0_128] : memref<16x128xbf16, #tpu.memory_space<vmem>>, vector<16x128xbf16>
    %cst_129 = arith.constant dense<0.000000e+00> : vector<16x128xf32>
    %196 = tpu.matmul %194, %195, %cst_129 {dimension_numbers = #tpu.dot_dimension_numbers<[1], [0], [0], [1], [0, 0, 1, 1], [], []>} : vector<16x16xbf16>, vector<16x128xbf16>, vector<16x128xf32> -> vector<16x128xf32>
    %c0_130 = arith.constant 0 : index
    %c0_131 = arith.constant 0 : index
    %197 = vector.load %arg23[%c0_130, %c0_131] : memref<1x128xf32, #tpu.memory_space<vmem>>, vector<1x128xf32>
    %198 = vector.broadcast %197 : vector<1x128xf32> to vector<16x128xf32>
    %199 = arith.addf %196, %198 : vector<16x128xf32>
    %c0_132 = arith.constant 0 : index
    %c0_133 = arith.constant 0 : index
    %200 = vector.load %arg24[%c0_132, %c0_133] : memref<16x128xf32, #tpu.memory_space<vmem>>, vector<16x128xf32>
    tpu.vector_store %arg24[%c0_132, %c0_133], %199 {strides = array<i32>} : memref<16x128xf32, #tpu.memory_space<vmem>>, vector<16x128xf32>,
    return
  }
  func.func @transform_0(%arg0: i32) -> (i32, i32) {
    %c0_i32 = arith.constant 0 : i32
    %c0_i32_0 = arith.constant 0 : i32
    return %arg0, %c0_i32 : i32, i32
  }
  func.func @transform_1(%arg0: i32) -> (i32, i32) {
    %c0_i32 = arith.constant 0 : i32
    %c0_i32_0 = arith.constant 0 : i32
    return %arg0, %c0_i32 : i32, i32
  }
  func.func @transform_2(%arg0: i32) -> (i32, i32) {
    %c0_i32 = arith.constant 0 : i32
    %c0_i32_0 = arith.constant 0 : i32
    return %arg0, %c0_i32 : i32, i32
  }
  func.func @transform_3(%arg0: i32) -> (i32, i32) {
    %c0_i32 = arith.constant 0 : i32
    %c0_i32_0 = arith.constant 0 : i32
    %c0_i32_1 = arith.constant 0 : i32
    return %c0_i32, %c0_i32_0 : i32, i32
  }
  func.func @transform_4(%arg0: i32) -> (i32, i32) {
    %c0_i32 = arith.constant 0 : i32
    %c0_i32_0 = arith.constant 0 : i32
    %c0_i32_1 = arith.constant 0 : i32
    return %c0_i32, %c0_i32_0 : i32, i32
  }
  func.func @transform_5(%arg0: i32) -> (i32, i32) {
    %c0_i32 = arith.constant 0 : i32
    %c0_i32_0 = arith.constant 0 : i32
    %c0_i32_1 = arith.constant 0 : i32
    return %c0_i32, %c0_i32_0 : i32, i32
  }
  func.func @transform_6(%arg0: i32) -> (i32, i32) {
    %c0_i32 = arith.constant 0 : i32
    %c0_i32_0 = arith.constant 0 : i32
    %c0_i32_1 = arith.constant 0 : i32
    return %c0_i32, %c0_i32_0 : i32, i32
  }
  func.func @transform_7(%arg0: i32) -> (i32, i32, i32) {
    %c0_i32 = arith.constant 0 : i32
    %c0_i32_0 = arith.constant 0 : i32
    %c0_i32_1 = arith.constant 0 : i32
    %c0_i32_2 = arith.constant 0 : i32
    return %c0_i32, %c0_i32_0, %c0_i32_1 : i32, i32, i32
  }
  func.func @transform_8(%arg0: i32) -> (i32, i32) {
    %c0_i32 = arith.constant 0 : i32
    %c0_i32_0 = arith.constant 0 : i32
    %c0_i32_1 = arith.constant 0 : i32
    return %c0_i32, %c0_i32_0 : i32, i32
  }
  func.func @transform_9(%arg0: i32) -> (i32, i32, i32) {
    %c0_i32 = arith.constant 0 : i32
    %c0_i32_0 = arith.constant 0 : i32
    %c0_i32_1 = arith.constant 0 : i32
    %c0_i32_2 = arith.constant 0 : i32
    return %c0_i32, %c0_i32_0, %c0_i32_1 : i32, i32, i32
  }
  func.func @transform_10(%arg0: i32) -> (i32, i32, i32) {
    %c0_i32 = arith.constant 0 : i32
    %c0_i32_0 = arith.constant 0 : i32
    %c0_i32_1 = arith.constant 0 : i32
    %c0_i32_2 = arith.constant 0 : i32
    return %c0_i32, %c0_i32_0, %c0_i32_1 : i32, i32, i32
  }
  func.func @transform_11(%arg0: i32) -> (i32, i32, i32) {
    %c0_i32 = arith.constant 0 : i32
    %c0_i32_0 = arith.constant 0 : i32
    %c0_i32_1 = arith.constant 0 : i32
    %c0_i32_2 = arith.constant 0 : i32
    return %c0_i32, %c0_i32_0, %c0_i32_1 : i32, i32, i32
  }
  func.func @transform_12(%arg0: i32) -> (i32, i32) {
    %c0_i32 = arith.constant 0 : i32
    %c0_i32_0 = arith.constant 0 : i32
    %c0_i32_1 = arith.constant 0 : i32
    return %c0_i32, %c0_i32_0 : i32, i32
  }
  func.func @transform_13(%arg0: i32) -> (i32, i32, i32) {
    %c0_i32 = arith.constant 0 : i32
    %c0_i32_0 = arith.constant 0 : i32
    %c0_i32_1 = arith.constant 0 : i32
    %c0_i32_2 = arith.constant 0 : i32
    return %c0_i32, %c0_i32_0, %c0_i32_1 : i32, i32, i32
  }
  func.func @transform_14(%arg0: i32) -> (i32, i32) {
    %c0_i32 = arith.constant 0 : i32
    %c0_i32_0 = arith.constant 0 : i32
    %c0_i32_1 = arith.constant 0 : i32
    return %c0_i32, %c0_i32_0 : i32, i32
  }
  func.func @transform_15(%arg0: i32) -> (i32, i32, i32) {
    %c0_i32 = arith.constant 0 : i32
    %c0_i32_0 = arith.constant 0 : i32
    %c0_i32_1 = arith.constant 0 : i32
    %c0_i32_2 = arith.constant 0 : i32
    return %c0_i32, %c0_i32_0, %c0_i32_1 : i32, i32, i32
  }
  func.func @transform_16(%arg0: i32) -> (i32, i32) {
    %c0_i32 = arith.constant 0 : i32
    %c0_i32_0 = arith.constant 0 : i32
    %c0_i32_1 = arith.constant 0 : i32
    return %c0_i32, %c0_i32_0 : i32, i32
  }
  func.func @transform_17(%arg0: i32) -> (i32, i32, i32) {
    %c0_i32 = arith.constant 0 : i32
    %c0_i32_0 = arith.constant 0 : i32
    %c0_i32_1 = arith.constant 0 : i32
    %c0_i32_2 = arith.constant 0 : i32
    return %c0_i32, %c0_i32_0, %c0_i32_1 : i32, i32, i32
  }
  func.func @transform_18(%arg0: i32) -> (i32, i32) {
    %c0_i32 = arith.constant 0 : i32
    %c0_i32_0 = arith.constant 0 : i32
    %c0_i32_1 = arith.constant 0 : i32
    return %c0_i32, %c0_i32_0 : i32, i32
  }
  func.func @transform_19(%arg0: i32) -> (i32, i32) {
    %c0_i32 = arith.constant 0 : i32
    %c0_i32_0 = arith.constant 0 : i32
    %c0_i32_1 = arith.constant 0 : i32
    return %c0_i32, %c0_i32_0 : i32, i32
  }
  func.func @transform_20(%arg0: i32) -> (i32, i32) {
    %c0_i32 = arith.constant 0 : i32
    %c0_i32_0 = arith.constant 0 : i32
    %c0_i32_1 = arith.constant 0 : i32
    return %c0_i32, %c0_i32_0 : i32, i32
  }
  func.func @transform_21(%arg0: i32) -> (i32, i32) {
    %c0_i32 = arith.constant 0 : i32
    %c0_i32_0 = arith.constant 0 : i32
    %c0_i32_1 = arith.constant 0 : i32
    return %c0_i32, %c0_i32_0 : i32, i32
  }
  func.func @transform_22(%arg0: i32) -> (i32, i32) {
    %c0_i32 = arith.constant 0 : i32
    %c0_i32_0 = arith.constant 0 : i32
    %c0_i32_1 = arith.constant 0 : i32
    return %c0_i32, %c0_i32_0 : i32, i32
  }
  func.func @transform_23(%arg0: i32) -> (i32, i32) {
    %c0_i32 = arith.constant 0 : i32
    %c0_i32_0 = arith.constant 0 : i32
    return %arg0, %c0_i32 : i32, i32
  }
}

</mosaic_0001>

<bundles_post_ra>
// kernel: wavenet_forward.1
= control target key start
LH: loop header
LB: loop body
LE: loop exit
PB: predicated region body
PF: predicated region fallthrough
CT: control target
= control target key end

     0   :  { %s3502_s0 = inlined_call_operand.vmem [shape: s32[64,1], index: 0, kind: input, shape index: {}]   ;;  %s3503_s1 = inlined_call_operand.vmem [shape: s32[64,1], index: 1, kind: input, shape index: {}]   ;;  %s3504_s2 = inlined_call_operand.vmem [shape: f32[64,2], index: 2, kind: input, shape index: {}]   ;;  %s3505_s3 = inlined_call_operand.vmem [shape: f32[16,1], index: 3, kind: input, shape index: {}]   ;;  %s3506_s4 = inlined_call_operand.vmem [shape: f32[16,1], index: 4, kind: input, shape index: {}]   ;;  %s3507_s5 = inlined_call_operand.vmem [shape: bf16[20,8], index: 5, kind: input, shape index: {}]   ;;  %s3508_s6 = inlined_call_operand.vmem [shape: bf16[3,8], index: 6, kind: input, shape index: {}]   ;;  %s3509_s7 = inlined_call_operand.vmem [shape: bf16[3,2,8], index: 7, kind: input, shape index: {}]   ;;  %s3510_s8 = inlined_call_operand.vmem [shape: f32[1,8], index: 8, kind: input, shape index: {}]   ;;  %s3511_s9 = inlined_call_operand.vmem [shape: bf16[3,8,16], index: 9, kind: input, shape index: {}]   ;;  %s3512_s10 = inlined_call_operand.vmem [shape: bf16[3,8,16], index: 10, kind: input, shape index: {}]   ;;  %s3513_s11 = inlined_call_operand.vmem [shape: bf16[3,8,16], index: 11, kind: input, shape index: {}]   ;;  %s3514_s12 = inlined_call_operand.vmem [shape: f32[1,16], index: 12, kind: input, shape index: {}]   ;;  %s3515_s13 = inlined_call_operand.vmem [shape: bf16[3,16,32], index: 13, kind: input, shape index: {}]   ;;  %s3516_s14 = inlined_call_operand.vmem [shape: f32[1,32], index: 14, kind: input, shape index: {}]   ;;  %s3517_s15 = inlined_call_operand.vmem [shape: bf16[3,32,64], index: 15, kind: input, shape index: {}]   ;;  %s3518_s16 = inlined_call_operand.vmem [shape: f32[1,64], index: 16, kind: input, shape index: {}]   ;;  %s3519_s17 = inlined_call_operand.vmem [shape: bf16[3,64,128], index: 17, kind: input, shape index: {}]   ;;  %s3520_s18 = inlined_call_operand.vmem [shape: f32[1,128], index: 18, kind: input, shape index: {}]   ;;  %s3521_s19 = inlined_call_operand.vmem [shape: bf16[128,16], index: 19, kind: input, shape index: {}]   ;;  %s3522_s20 = inlined_call_operand.vmem [shape: f32[1,16], index: 20, kind: input, shape index: {}]   ;;  %s3523_s21 = inlined_call_operand.vmem [shape: bf16[16,128], index: 21, kind: input, shape index: {}]   ;;  %s3524_s22 = inlined_call_operand.vmem [shape: f32[1,128], index: 22, kind: input, shape index: {}]   ;;  %s3525_s23 = inlined_call_operand.vmem [shape: f32[64,128], index: 23, kind: output, shape index: {}]  }
   0x1   :  { %3530 = sst [smem:[#allocation2_spill]] %s3502_s0 }
   0x2   :  { %3531 = sst [smem:[#allocation3_spill]] %s3503_s1 }
   0x3   :  { %3532 = sst [smem:[#allocation4_spill]] %s3504_s2 }
   0x4   :  { %3533 = sst [smem:[#allocation5_spill]] %s3505_s3 }
   0x5   :  { %3534 = sst [smem:[#allocation6_spill]] %s3506_s4  ;;  %s3077_s4 = smov 0  }
   0x6   :  { %3535 = sst [smem:[#allocation7_spill]] %s3507_s5 }
   0x7   :  { %3536 = sst [smem:[#allocation8_spill]] %s3508_s6 }
   0x8   :  { %3537 = sst [smem:[#allocation9_spill]] %s3509_s7 }
   0x9 LB: > { %s2521_s30 = sadd.s32 4294967295, %s2951_s4   ;;  %p2525_p0 = scmp.ge.s32.totalorder %s2951_s4, 1  ;;  %s2951_s4 = sphi %s3077_s4, %s33_s4  }
   0xa   : > { %p660_p1 = scmp.lt.s32.totalorder %s2951_s4, 5 }
   0xc   : > { %p661_p2 = pnand %p2525_p0, %p660_p1 }
   0xd   : > { %s2526_s24 = sshll.u32 (!%p661_p2), %s2521_s30, 1  ;;  %v2953_v0 = vmov (!%p661_p2), 0   ;;  %v2954_v1 = vmov (!%p661_p2), 0.0   ;;  %s3538_s26 = sld [smem:[#allocation3_spill]] (!%p661_p2)  ;;  %vm861_vm0 = vcmask (!%p661_p2), 1040384   ;;  %vm796_vm1 = vcmask (!%p661_p2), 1041408  }
   0xe   : > { %664 = sbr.rel (%p661_p2) target bundleno = 1774 (0x6ee), region = 112  ;;  %2912 = vset.pattern.permute.xlu1 (!%p661_p2), %v2953_v0  ;;  %2911 = vset.pattern.permute.xlu0 (!%p661_p2), %v2953_v0  ;;  %p735_p3 = scmp.lt.s32.totalorder (!%p661_p2), %s2526_s24, 7  ;;  %v2955_v7 = vmov (!%p661_p2), 65535   ;;  %vm2956_vm2 = vmmov (!%p661_p2), 0   ;;  %v765_v18 = vlaneseq (!%p661_p2)  ;;  %vm857_vm7 = vcmask (!%p661_p2), 23552  }
   0xf   : > { %2709 = vmatprep.subr.bf16.mxu0 (!%p661_p2), %v2954_v1  ;;  %2717 = vmatprep.subr.bf16.mxu1 (!%p661_p2), %v2954_v1  ;;  %s3539_s7 = sld [smem:[#allocation2_spill]] (!%p661_p2)  ;;  %s3540_s0 = sld [smem:[#allocation7_spill]] (!%p661_p2)  ;;  %v862_v8 = vsel (!%p661_p2), %vm861_vm0, 4294967295, %v2955_v7  ;;  %vm792_vm8 = vcmask (!%p661_p2), 162816   ;;  %vm951_vm10 = vcmask (!%p661_p2), 15360   ;;  %vm1130_vm12 = vcmask (!%p661_p2), 1043456  }
  0x10   : > { %s3541_s5 = sld [smem:[#allocation5_spill]] (!%p661_p2)  ;;  %s3542_s6 = sld [smem:[#allocation8_spill]] (!%p661_p2)  ;;  %v863_v11 = vsel (!%p661_p2), %vm796_vm1, %v862_v8, 0  ;;  %2713 = vmatprep.mubr.msk.bf16.mxu0 (!%p661_p2), %vm2956_vm2, %v2954_v1  ;;  %2719 = vmatprep.mubr.msk.bf16.mxu1 (!%p661_p2), %vm2956_vm2, %v2954_v1  ;;  %v766_v19 = vand.u32 (!%p661_p2), 127, %v765_v18  ;;  %v3138_v34 = vshrl.u32 (!%p661_p2), %v765_v18, 7  ;;  %vm1126_vm13 = vcmask (!%p661_p2), 64512  }
  0x11   : > { %s3543_s30 = sld [smem:[#allocation6_spill]] (!%p661_p2)  ;;  %v2548_v58 = vld [vmem:[%s3511_s9 + $0x4] sm:$0xf] (!%p661_p2)  ;;  %v1122_v60 = vld [vmem:[%s3511_s9] sm:$0xf] (!%p661_p2)  ;;  %vm1632_vm14 = vcmask (!%p661_p2), 130048  }
  0x12   : > { %vm914_vm9 = vcmp.lt.s32.totalorder (!%p661_p2), %v3138_v34, 1  ;;  %vm931_vm11 = vcmp.lt.s32.totalorder (!%p661_p2), %v3138_v34, 7  ;;  %v1132_v59 = vsel (!%p661_p2), %vm1130_vm12, %v2548_v58, 0  ;;  %v1179_v61 = vsel (!%p661_p2), %vm1130_vm12, %v1122_v60, 0  ;;  %v2936_v34 = vld [vmem:[%s3521_s19] sm:$0xff] (!%p661_p2)  }
  0x13   : > { %vm1829_vm15 = vcmask (!%p661_p2), 261120  }
  0x15   : > { %s3547_s24 = smov (!%p735_p3, %s2526_s24), 7  ;;  %v2913_v6 = vld [vmem:[%s3540_s0] sm:$0xff]   ;;  %v2914_v12 = vld [vmem:[%s3540_s0 + $0x8] ss:$0 sps:$4 sm:$0x33]  }
  0x16   : > { %s3087_s25 = sshll.u32 %s3547_s24, 3  ;;  %v759_v9 = vld [vmem:[%s3541_s5] sm:$0xff]  ;;  %2710 = vmatpush3.bf16.msra.mxu0 %v2913_v6  ;;  %v760_v14 = vld [vmem:[%s3541_s5 + $0x8] sm:$0xff]  ;;  %v798_v15 = vsel %vm796_vm1, %v2914_v12, 0 }
  0x17   : > { %s744_s2 = scalar_lea.vmem %s3538_s26, %s3087_s25  ;;  %s738_s28 = scalar_lea.vmem %s3539_s7, %s3087_s25  ;;  %v856_v10 = vld [vmem:[%s3542_s6] sm:$0x3]  ;;  %2711 = vmatprep.subr.bf16.mxu0 %v2954_v1  ;;  %v762_v17 = vld [vmem:[%s3543_s30 + $0x8] sm:$0xff] }
  0x18   : > { %v841_v2 = vld [vmem:[%s744_s2] sm:$0xff]  ;;  %v842_v4 = vld [vmem:[%s744_s2 + $0x8] sm:$0xff]  ;;  %v865_v13 = vand.u32 %v863_v11, %v856_v10  ;;  %s3544_s2 = sld [smem:[#allocation9_spill]] }
  0x19   : > { %844 = vperm.xlu0 %2911, %v841_v2   ;;  %v763_v3 = vld [vmem:[%s738_s28] sm:$0xff]  ;;  %v764_v5 = vld [vmem:[%s738_s28 + $0x8] sm:$0xff]  ;;  %s3545_s28 = sld [smem:[#allocation4_spill]] }
  0x1a   : > { %768 = vperm.xlu1 %2912, %v763_v3   ;;  %2718 = vmatpush3.bf16.msra.mxu1 %v865_v13  ;;  %v761_v16 = vld [vmem:[%s3543_s30] sm:$0xff]  ;;  %v2551_v2 = vld [vmem:[%s3511_s9 + $0x8] sm:$0xf] }
  0x1b   : > { %2712 = vmatpush3.bf16.msra.mxu0 %v798_v15  ;;  %2723 = vmatprep.subr.bf16.mxu1 %v2954_v1  ;;  %v1229_v18 = vsel %vm1130_vm12, %v2551_v2, 0 }
  0x1c   : > { %2741 = vmatprep.subr.bf16.mxu0 %v2954_v1 }
  0x1d   : > { %847 = vperm.xlu0 %2911, %v842_v4  }
  0x1e   : > { %771 = vperm.xlu1 %2912, %v764_v5   ;;  %v2542_v23 = vld [vmem:[%s3544_s2 + $0x1] sm:$0x1]  ;;  %v947_v37 = vld [vmem:[%s3544_s2] sm:$0x1]  ;;  %v2545_v48 = vld [vmem:[%s3544_s2 + $0x2] sm:$0x1] }
  0x1f   : > { %s750_s29 = scalar_lea.vmem %s3545_s28, %s3087_s25  ;;  %v956_v30 = vsel %vm861_vm0, %v2542_v23, 0  ;;  %v1003_v39 = vsel %vm861_vm0, %v947_v37, 0  ;;  %v1053_v50 = vsel %vm861_vm0, %v2545_v48, 0  ;;  %vm2060_vm0 = vcmask 523264  }
  0x20   : > { %v908_v32 = vld [vmem:[%s750_s29] sm:$0xff]  ;;  %v909_v33 = vld [vmem:[%s750_s29 + $0x8] sm:$0xff]  ;;  %s756_s29 = scalar_lea.vmem %s3525_s23, %s3087_s25 }
  0x21   : > { %919 = vperm.xlu0 %2911, %v759_v9   ;;  %v910_v35 = vrot.slane %v908_v32, 7  ;;  %v911_v36 = vrot.slane %v909_v33, 7  ;;  %v948_v38 = vpack.c.bf16 %v909_v33, %v908_v32  ;;  %v929_v46 = vrot.slane %v908_v32, 1 }
  0x22   : > { %924 = vperm.xlu1 %2912, %v760_v14   ;;  %v930_v47 = vrot.slane %v909_v33, 1 }
  0x23   : > { %v915_v42 = vsel %vm914_vm9, %v910_v35, %v911_v36  ;;  %v916_v43 = vsel %vm914_vm9, %v911_v36, %v910_v35  ;;  %v1279_v36 = vld [vmem:[%s3512_s10] sm:$0xf] }
  0x24   : > { %v932_v51 = vsel %vm931_vm11, %v929_v46, %v930_v47  ;;  %v933_v53 = vsel %vm931_vm11, %v930_v47, %v929_v46  ;;  %v2558_v47 = vld [vmem:[%s3513_s11 + $0x4] sm:$0xf] }
  0x25   : > { %936 = vperm.xlu0 %2911, %v761_v16  }
  0x26   : > { %941 = vperm.xlu1 %2912, %v762_v17  }
  0x98   : > { %v845_v20 = vpop.permute.xlu0 %844 }
  0x99   : > { %v769_v21 = vpop.permute.xlu1 %768  ;;  %vm849_vm4 = vcmp.eq.s32.totalorder %v845_v20, %v766_v19 }
  0x9a   : > { %vm773_vm3 = vcmp.eq.s32.totalorder %v769_v21, %v766_v19  ;;  %v2539_v26 = vsel %vm849_vm4, 1.0, %v2954_v1 }
  0x9b   : > { %v2534_v24 = vsel %vm773_vm3, 1.0, %v2954_v1 }
  0x9c   : > { %v848_v22 = vpop.permute.xlu0 %847 }
  0x9d   : > { %vm850_vm5 = vcmp.eq.s32.totalorder %v848_v22, %v766_v19  ;;  %v772_v25 = vpop.permute.xlu1 %771 }
  0x9e   : > { %v2540_v27 = vsel %vm850_vm5, 1.0, %v2954_v1  ;;  %vm774_vm6 = vcmp.eq.s32.totalorder %v772_v25, %v766_v19  ;;  %v2553_v25 = vld [vmem:[%s3512_s10 + $0x4] sm:$0xf] }
  0x9f   : > { %v855_v28 = vpack.c.bf16 %v2540_v27, %v2539_v26  ;;  %v2535_v29 = vsel %vm774_vm6, 1.0, %v2954_v1  ;;  %v1287_v35 = vsel %vm1130_vm12, %v2553_v25, 0 }
  0xa0   : > { %v779_v31 = vpack.c.bf16 %v2535_v29, %v2534_v24  ;;  %v3150_v40 = vpop.permute.xlu0 %919 }
  0xa1   : > { %2720 = vmatmul.mubr.msk.bf16.vlgmr.msra.gmra.mrb[0].mxu1 %vm857_vm7, %v855_v28  ;;  %v3152_v41 = vpop.permute.xlu1 %924  ;;  %v927_v44 = vmul.f32 %v3150_v40, %v916_v43 }
  0xa2   : > { %2714 = vmatmul.mubr.msk.bf16.vlgmr.msra.gmra.mrb[0].mxu0 %vm792_vm8, %v779_v31  ;;  %2724 = vmatpush3.bf16.msra.mxu1 %v956_v30  ;;  %v928_v45 = vmul.f32 %v3152_v41, %v915_v42  ;;  %v2556_v42 = vld [vmem:[%s3512_s10 + $0x8] sm:$0xf] }
  0xa3   : > { %2725 = vmatprep.mubr.msk.bf16.mxu1 %vm2956_vm2, %v2954_v1  ;;  %2729 = vmatprep.subr.bf16.mxu1 %v2954_v1  ;;  %v1384_v46 = vsel %vm1130_vm12, %v2556_v42, 0 }
  0xa4   : > { %2743 = vmatprep.mubr.msk.bf16.mxu0 %vm2956_vm2, %v2954_v1  ;;  %v946_v49 = vpack.c.bf16 %v928_v45, %v927_v44  ;;  %v3171_v52 = vpop.permute.xlu0 %936  ;;  %2742 = vmatpush3.bf16.msra.mxu0 %v1132_v59 }
  0xa5   : > { %v3175_v54 = vpop.permute.xlu1 %941  ;;  %v944_v55 = vmul.f32 %v3171_v52, %v932_v51  ;;  %2753 = vmatprep.subr.bf16.mxu0 %v2954_v1  ;;  %v1452_v51 = vsel %vm1130_vm12, %v2558_v47, 0 }
  0xa6   : > { %v945_v56 = vmul.f32 %v3175_v54, %v933_v53  ;;  %v1444_v53 = vld [vmem:[%s3513_s11] sm:$0xf] }
  0xa7   : > { %v1499_v59 = vsel %vm1130_vm12, %v1444_v53, 0 }
  0xa8   : > { %v1046_v57 = vpack.c.bf16 %v945_v56, %v944_v55  ;;  %v2547_v56 = vld [vmem:[%s3510_s8] ss:$0 sm:$0xff] }
  0xa9   : > { %2726 = vmatmul.mubr.msk.bf16.vlgmr.msra.gmra.mrb[4].mxu1 %vm951_vm10, %v948_v38 }
  0xaa   : > { %2730 = vmatpush3.bf16.msra.mxu1 %v1003_v39  ;;  %2731 = vmatprep.mubr.msk.bf16.mxu1 %vm2956_vm2, %v2954_v1  ;;  %v1334_v39 = vsel %vm1130_vm12, %v1279_v36, 0 }
  0xab   : > { %2735 = vmatprep.subr.bf16.mxu1 %v2954_v1 }
  0xb1   : > { %2732 = vmatmul.mubr.msk.bf16.vlgmr.msra.gmra.mrb[8].mxu1 %vm951_vm10, %v946_v49 }
  0xb2   : > { %2736 = vmatpush3.bf16.msra.mxu1 %v1053_v50  ;;  %2737 = vmatprep.mubr.msk.bf16.mxu1 %vm2956_vm2, %v2954_v1 }
  0xb3   : > { %2747 = vmatprep.subr.bf16.mxu1 %v2954_v1 }
  0xb9   : > { %2738 = vmatmul.mubr.msk.bf16.vlgmr.msra.gmra.mrb[12].mxu1 %vm951_vm10, %v1046_v57 }
  0xba   : > { %2749 = vmatprep.mubr.msk.bf16.mxu1 %vm2956_vm2, %v2954_v1  ;;  %2748 = vmatpush3.bf16.msra.mxu1 %v1179_v61 }
  0xbb   : > { %2759 = vmatprep.subr.bf16.mxu1 %v2954_v1 }
 0x174   : > { %v901_v62 = vpop.f32.mrb[0].mxu1 }
 0x175   : > { %v834_v63 = vpop.f32.mrb[0].mxu0  ;;  %v2721_v0 = vpop.f32.mrb[1].mxu1  ;;  %v1274_v5 = vmul.f32 %v3150_v40, %v901_v62  ;;  %v3201_v8 = vmul.f32 %v3171_v52, %v901_v62 }
 0x176   : > { %v1109_v3 = vrot.slane %v834_v63, 7  ;;  %v1115_v4 = vrot.slane %v834_v63, 1  ;;  %v2715_v6 = vpop.f32.mrb[1].mxu0  ;;  %v904_v7 = vpop.f32.mrb[2].mxu1 }
 0x177   : > { %v837_v9 = vpop.f32.mrb[2].mxu0  ;;  %v1275_v10 = vmul.f32 %v3152_v41, %v904_v7  ;;  %v3205_v11 = vmul.f32 %v3175_v54, %v904_v7  ;;  %v1280_v12 = vpack.c.bf16 %v904_v7, %v901_v62  ;;  %v2722_v13 = vpop.f32.mrb[3].mxu1 }
 0x178   : > { %v1110_v14 = vrot.slane %v837_v9, 7  ;;  %v1116_v15 = vrot.slane %v837_v9, 1  ;;  %v1123_v16 = vpack.c.bf16 %v837_v9, %v834_v63  ;;  %v2716_v17 = vpop.f32.mrb[3].mxu0 }
 0x179   : > { %v1278_v19 = vpack.c.bf16 %v1275_v10, %v1274_v5  ;;  %v1377_v20 = vpack.c.bf16 %v3205_v11, %v3201_v8 }
 0x17a   : > { %v1111_v21 = vsel %vm914_vm9, %v1109_v3, %v1110_v14  ;;  %v1112_v22 = vsel %vm914_vm9, %v1110_v14, %v1109_v3  ;;  %v1117_v23 = vsel %vm931_vm11, %v1115_v4, %v1116_v15  ;;  %v1118_v24 = vsel %vm931_vm11, %v1116_v15, %v1115_v4  ;;  %2744 = vmatmul.mubr.msk.bf16.vlgmr.msra.gmra.mrb[4].mxu0 %vm1126_vm13, %v1123_v16  ;;  %v2561_v3 = vld [vmem:[%s3513_s11 + $0x8] sm:$0xf] }
 0x17b   : > { %v1113_v26 = vmul.f32 %v1112_v22, %v3150_v40  ;;  %v1114_v27 = vmul.f32 %v1111_v21, %v3152_v41  ;;  %v1119_v28 = vmul.f32 %v1117_v23, %v3171_v52  ;;  %v1120_v29 = vmul.f32 %v1118_v24, %v3175_v54  ;;  %2754 = vmatpush3.bf16.msra.mxu0 %v1229_v18  ;;  %v2915_v21 = vld [vmem:[%s3515_s13 + $0x8] sm:$0xff]   ;;  %v2916_v22 = vld [vmem:[%s3515_s13] sm:$0xff]  }
 0x17c   : > { %v992_v30 = vpop.f32.mrb[4].mxu1  ;;  %2755 = vmatprep.mubr.msk.bf16.mxu0 %vm2956_vm2, %v2954_v1  ;;  %2765 = vmatprep.subr.bf16.mxu0 %v2954_v1  ;;  %v1549_v6 = vsel %vm1130_vm12, %v2561_v3, 0 }
 0x17d   : > { %v1121_v31 = vpack.c.bf16 %v1114_v27, %v1113_v26  ;;  %v1222_v32 = vpack.c.bf16 %v1120_v29, %v1119_v28  ;;  %v2727_v33 = vpop.f32.mrb[5].mxu1 }
 0x17e   : > { %v995_v37 = vpop.f32.mrb[6].mxu1 }
 0x17f   : > { %2750 = vmatmul.mubr.msk.bf16.vlgmr.msra.gmra.mrb[16].mxu1 %vm1126_vm13, %v1121_v31  ;;  %v2728_v38 = vpop.f32.mrb[7].mxu1 }
 0x180   : > { %2760 = vmatpush3.bf16.msra.mxu1 %v1287_v35  ;;  %2761 = vmatprep.mubr.msk.bf16.mxu1 %vm2956_vm2, %v2954_v1 }
 0x181   : > { %2771 = vmatprep.subr.bf16.mxu1 %v2954_v1 }
 0x182   : > { %2756 = vmatmul.mubr.msk.bf16.vlgmr.msra.gmra.mrb[8].mxu0 %vm1126_vm13, %v1222_v32 }
 0x183   : > { %2766 = vmatpush3.bf16.msra.mxu0 %v1334_v39  ;;  %2767 = vmatprep.mubr.msk.bf16.mxu0 %vm2956_vm2, %v2954_v1 }
 0x184   : > { %v1039_v43 = vpop.f32.mrb[8].mxu1  ;;  %2777 = vmatprep.subr.bf16.mxu0 %v2954_v1 }
 0x185   : > { %v1040_v44 = vadd.f32 %v1039_v43, %v992_v30  ;;  %v2733_v45 = vpop.f32.mrb[9].mxu1 }
 0x186   : > { %v1042_v48 = vpop.f32.mrb[10].mxu1 }
 0x187   : > { %v1043_v49 = vadd.f32 %v1042_v48, %v995_v37  ;;  %2762 = vmatmul.mubr.msk.bf16.vlgmr.msra.gmra.mrb[20].mxu1 %vm1126_vm13, %v1280_v12  ;;  %v2734_v50 = vpop.f32.mrb[11].mxu1 }
 0x188   : > { %2772 = vmatpush3.bf16.msra.mxu1 %v1384_v46  ;;  %2773 = vmatprep.mubr.msk.bf16.mxu1 %vm2956_vm2, %v2954_v1 }
 0x189   : > { %2783 = vmatprep.subr.bf16.mxu1 %v2954_v1 }
 0x18a   : > { %2768 = vmatmul.mubr.msk.bf16.vlgmr.msra.gmra.mrb[12].mxu0 %vm1126_vm13, %v1278_v19 }
 0x18b   : > { %2778 = vmatpush3.bf16.msra.mxu0 %v1452_v51  ;;  %2779 = vmatprep.mubr.msk.bf16.mxu0 %vm2956_vm2, %v2954_v1 }
 0x18c   : > { %v1089_v55 = vpop.f32.mrb[12].mxu1  ;;  %2789 = vmatprep.subr.bf16.mxu0 %v2954_v1 }
 0x18d   : > { %v1096_v57 = vadd.f32 %v1089_v55, %v1040_v44  ;;  %v2739_v58 = vpop.f32.mrb[13].mxu1 }
 0x18e   : > { %v1092_v60 = vpop.f32.mrb[14].mxu1 }
 0x18f   : > { %v1105_v61 = vadd.f32 %v2547_v56, %v1096_v57  ;;  %v1097_v62 = vadd.f32 %v1092_v60, %v1043_v49  ;;  %2774 = vmatmul.mubr.msk.bf16.vlgmr.msra.gmra.mrb[24].mxu1 %vm1126_vm13, %v1377_v20  ;;  %v2740_v63 = vpop.f32.mrb[15].mxu1 }
 0x190   : > { %2784 = vmatpush3.bf16.msra.mxu1 %v1499_v59  ;;  %2785 = vmatprep.mubr.msk.bf16.mxu1 %vm2956_vm2, %v2954_v1 }
 0x191   : > { %v1107_v0 = vmax.f32 %v1105_v61, 0.0  ;;  %v1106_v2 = vadd.f32 %v2547_v56, %v1097_v62  ;;  %2795 = vmatprep.subr.bf16.mxu1 %v2954_v1 }
 0x193   : > { %v1108_v4 = vmax.f32 %v1106_v2, 0.0  ;;  %v1431_v5 = vrot.slane %v1107_v0, 7  ;;  %v1437_v7 = vrot.slane %v1107_v0, 1 }
 0x195   : > { %v1432_v8 = vrot.slane %v1108_v4, 7  ;;  %v1438_v9 = vrot.slane %v1108_v4, 1  ;;  %v1445_v10 = vpack.c.bf16 %v1108_v4, %v1107_v0 }
 0x197   : > { %v1433_v11 = vsel %vm914_vm9, %v1431_v5, %v1432_v8  ;;  %v1434_v12 = vsel %vm914_vm9, %v1432_v8, %v1431_v5  ;;  %v1439_v13 = vsel %vm931_vm11, %v1437_v7, %v1438_v9  ;;  %v1440_v14 = vsel %vm931_vm11, %v1438_v9, %v1437_v7  ;;  %2780 = vmatmul.mubr.msk.bf16.vlgmr.msra.gmra.mrb[16].mxu0 %vm1126_vm13, %v1445_v10 }
 0x198   : > { %v1435_v15 = vmul.f32 %v1434_v12, %v3150_v40  ;;  %v1436_v16 = vmul.f32 %v1433_v11, %v3152_v41  ;;  %v1441_v17 = vmul.f32 %v1439_v13, %v3171_v52  ;;  %v1442_v18 = vmul.f32 %v1440_v14, %v3175_v54  ;;  %2790 = vmatpush3.bf16.msra.mxu0 %v1549_v6  ;;  %v2563_v12 = vld [vmem:[%s3514_s12] ss:$0 sm:$0xff] }
 0x199   : > { %2791 = vmatprep.mubr.msk.bf16.mxu0 %vm2956_vm2, %v2954_v1  ;;  %2801 = vmatprep.subr.bf16.mxu0 %v2954_v1 }
 0x19a   : > { %v1443_v19 = vpack.c.bf16 %v1436_v16, %v1435_v15  ;;  %v1542_v20 = vpack.c.bf16 %v1442_v18, %v1441_v17 }
 0x19c   : > { %2786 = vmatmul.mubr.msk.bf16.vlgmr.msra.gmra.mrb[28].mxu1 %vm1126_vm13, %v1443_v19 }
 0x19d   : > { %2797 = vmatprep.mubr.msk.bf16.mxu1 %vm2956_vm2, %v2954_v1  ;;  %2796 = vmatpush3.bf16.msra.mxu1 %v2915_v21 }
 0x19e   : > { %2807 = vmatprep.subr.bf16.mxu1 %v2954_v1 }
 0x19f   : > { %2792 = vmatmul.mubr.msk.bf16.vlgmr.msra.gmra.mrb[20].mxu0 %vm1126_vm13, %v1542_v20 }
 0x1a0   : > { %2803 = vmatprep.mubr.msk.bf16.mxu0 %vm2956_vm2, %v2954_v1  ;;  %2802 = vmatpush3.bf16.msra.mxu0 %v2916_v22 }
 0x1a1   : > { %2813 = vmatprep.subr.bf16.mxu0 %v2954_v1 }
 0x24d   : > { %v1168_v23 = vpop.f32.mrb[4].mxu0 }
 0x24e   : > { %v2745_v24 = vpop.f32.mrb[5].mxu0 }
 0x24f   : > { %v1171_v25 = vpop.f32.mrb[6].mxu0 }
 0x250   : > { %v2746_v26 = vpop.f32.mrb[7].mxu0 }
 0x252   : > { %v1215_v27 = vpop.f32.mrb[16].mxu1 }
 0x253   : > { %v1216_v28 = vadd.f32 %v1215_v27, %v1168_v23  ;;  %v2751_v29 = vpop.f32.mrb[17].mxu1  ;;  %v2917_v23 = vld [vmem:[%s3515_s13 + $0x10] sm:$0xff]  }
 0x254   : > { %v1218_v30 = vpop.f32.mrb[18].mxu1 }
 0x255   : > { %v1219_v31 = vadd.f32 %v1218_v30, %v1171_v25  ;;  %v2752_v32 = vpop.f32.mrb[19].mxu1  ;;  %v1265_v33 = vpop.f32.mrb[8].mxu0 }
 0x256   : > { %v1272_v35 = vadd.f32 %v1265_v33, %v1216_v28  ;;  %v2757_v36 = vpop.f32.mrb[9].mxu0 }
 0x257   : > { %v1268_v37 = vpop.f32.mrb[10].mxu0 }
 0x258   : > { %v1273_v38 = vadd.f32 %v1268_v37, %v1219_v31  ;;  %v2758_v39 = vpop.f32.mrb[11].mxu0 }
 0x259   : > { %v2918_v39 = vld [vmem:[%s3517_s15 + $0x10] sm:$0xff]  }
 0x25a   : > { %v1323_v42 = vpop.f32.mrb[20].mxu1 }
 0x25b   : > { %v2763_v43 = vpop.f32.mrb[21].mxu1 }
 0x25c   : > { %v1326_v44 = vpop.f32.mrb[22].mxu1  ;;  %v2920_v43 = vld [vmem:[%s3517_s15] sm:$0xff]  }
 0x25d   : > { %v2764_v45 = vpop.f32.mrb[23].mxu1  ;;  %v1370_v46 = vpop.f32.mrb[12].mxu0 }
 0x25e   : > { %v1371_v47 = vadd.f32 %v1370_v46, %v1323_v42  ;;  %v2769_v48 = vpop.f32.mrb[13].mxu0  ;;  %v2919_v42 = vld [vmem:[%s3517_s15 + $0x18] sm:$0xff]  }
 0x25f   : > { %v1373_v49 = vpop.f32.mrb[14].mxu0 }
 0x260   : > { %v1374_v50 = vadd.f32 %v1373_v49, %v1326_v44  ;;  %v2770_v51 = vpop.f32.mrb[15].mxu0  ;;  %v2922_v44 = vld [vmem:[%s3517_s15 + $0x8] sm:$0xff]  }
 0x262   : > { %v1420_v53 = vpop.f32.mrb[24].mxu1 }
 0x263   : > { %v1427_v55 = vadd.f32 %v1420_v53, %v1371_v47  ;;  %v2775_v56 = vpop.f32.mrb[25].mxu1 }
 0x264   : > { %v1423_v57 = vpop.f32.mrb[26].mxu1 }
 0x265   : > { %v1429_v58 = vadd.f32 %v1427_v55, %v1272_v35  ;;  %v1428_v59 = vadd.f32 %v1423_v57, %v1374_v50  ;;  %v2776_v60 = vpop.f32.mrb[27].mxu1 }
 0x267   : > { %v1430_v61 = vadd.f32 %v1428_v59, %v1273_v38 }
 0x26a   : > { %v1488_v62 = vpop.f32.mrb[16].mxu0 }
 0x26b   : > { %v2781_v63 = vpop.f32.mrb[17].mxu0 }
 0x26c   : > { %v1491_v0 = vpop.f32.mrb[18].mxu0 }
 0x26d   : > { %v2782_v2 = vpop.f32.mrb[19].mxu0 }
 0x26f   : > { %v1535_v3 = vpop.f32.mrb[28].mxu1 }
 0x270   : > { %v1536_v4 = vadd.f32 %v1535_v3, %v1488_v62  ;;  %v2787_v5 = vpop.f32.mrb[29].mxu1 }
 0x271   : > { %v1538_v6 = vpop.f32.mrb[30].mxu1 }
 0x272   : > { %v1539_v7 = vadd.f32 %v1538_v6, %v1491_v0  ;;  %v2788_v8 = vpop.f32.mrb[31].mxu1  ;;  %v1585_v9 = vpop.f32.mrb[20].mxu0  ;;  %v2921_v6 = vld [vmem:[%s3517_s15 + $0x20] sm:$0xff]  }
 0x273   : > { %v1592_v10 = vadd.f32 %v1585_v9, %v1536_v4  ;;  %v2793_v11 = vpop.f32.mrb[21].mxu0 }
 0x274   : > { %v1588_v13 = vpop.f32.mrb[22].mxu0 }
 0x275   : > { %v1594_v14 = vadd.f32 %v1592_v10, %v1429_v58  ;;  %v1593_v15 = vadd.f32 %v1588_v13, %v1539_v7  ;;  %v2794_v16 = vpop.f32.mrb[23].mxu0  ;;  %v2574_v58 = vld [vmem:[%s3516_s14] ss:$0 sm:$0xff] }
 0x277   : > { %v1603_v17 = vadd.f32 %v2563_v12, %v1594_v14  ;;  %v1595_v18 = vadd.f32 %v1593_v15, %v1430_v61 }
 0x279   : > { %v1605_v19 = vmax.f32 %v1603_v17, 0.0  ;;  %v1604_v20 = vadd.f32 %v2563_v12, %v1595_v18 }
 0x27b   : > { %v1606_v21 = vmax.f32 %v1604_v20, 0.0  ;;  %v1607_v22 = vrot.slane %v1605_v19, 7  ;;  %v1613_v24 = vrot.slane %v1605_v19, 1 }
 0x27d   : > { %v1608_v25 = vrot.slane %v1606_v21, 7  ;;  %v1614_v26 = vrot.slane %v1606_v21, 1  ;;  %v1622_v27 = vpack.c.bf16 %v1606_v21, %v1605_v19  ;;  %v2923_v19 = vld [vmem:[%s3517_s15 + $0x28] sm:$0xff]  }
 0x27f   : > { %v1609_v28 = vsel %vm914_vm9, %v1607_v22, %v1608_v25  ;;  %v1610_v29 = vsel %vm914_vm9, %v1608_v25, %v1607_v22  ;;  %v1615_v30 = vsel %vm931_vm11, %v1613_v24, %v1614_v26  ;;  %v1616_v31 = vsel %vm931_vm11, %v1614_v26, %v1613_v24  ;;  %2798 = vmatmul.mubr.msk.bf16.vlgmr.msra.gmra.mrb[32].mxu1 %vm1632_vm14, %v1622_v27  ;;  %v2924_v22 = vld [vmem:[%s3519_s17 + $0x20] sm:$0xff]   ;;  %v2927_v25 = vld [vmem:[%s3519_s17 + $0x30] sm:$0xff]   ;;  %v2928_v26 = vld [vmem:[%s3519_s17 + $0x8] sm:$0xff]  }
 0x280   : > { %2808 = vmatpush3.bf16.msra.mxu1 %v2917_v23  ;;  %v1611_v32 = vmul.f32 %v1610_v29, %v3150_v40  ;;  %v1612_v33 = vmul.f32 %v1609_v28, %v3152_v41  ;;  %2809 = vmatprep.mubr.msk.bf16.mxu1 %vm2956_vm2, %v2954_v1  ;;  %v1617_v35 = vmul.f32 %v1615_v30, %v3171_v52  ;;  %v2925_v23 = vld [vmem:[%s3519_s17 + $0x28] sm:$0xff]   ;;  %v2926_v24 = vld [vmem:[%s3519_s17] sm:$0xff]   ;;  %v2929_v27 = vld [vmem:[%s3519_s17 + $0x38] sm:$0xff]  }
 0x281   : > { %v1618_v36 = vmul.f32 %v1616_v31, %v3175_v54  ;;  %2821 = vmatprep.subr.bf16.mxu1 %v2954_v1  ;;  %v2930_v28 = vld [vmem:[%s3519_s17 + $0x10] sm:$0xff]   ;;  %v2932_v29 = vld [vmem:[%s3519_s17 + $0x18] sm:$0xff]  }
 0x282   : > { %v1619_v37 = vpack.c.bf16 %v1612_v33, %v1611_v32 }
 0x283   : > { %v1727_v38 = vpack.c.bf16 %v1618_v36, %v1617_v35 }
 0x284   : > { %2804 = vmatmul.mubr.msk.bf16.vlgmr.msra.gmra.mrb[24].mxu0 %vm1632_vm14, %v1619_v37 }
 0x285   : > { %2817 = vmatprep.mubr.msk.bf16.mxu0 %vm2956_vm2, %v2954_v1  ;;  %2814 = vmatpush3.bf16.msra.mxu0 %v2918_v39 }
 0x286   : > { %2815 = vmatprep.subr.bf16.mxu0 %v2954_v1 }
 0x287   : > { %2810 = vmatmul.mubr.msk.bf16.vlgmr.msra.gmra.mrb[36].mxu1 %vm1632_vm14, %v1727_v38 }
 0x288   : > { %2825 = vmatprep.mubr.msk.bf16.mxu1 %vm2956_vm2, %v2954_v1  ;;  %2822 = vmatpush3.bf16.msra.mxu1 %v2920_v43 }
 0x289   : > { %2816 = vmatpush3.bf16.msra.mxu0 %v2919_v42  ;;  %2823 = vmatprep.subr.bf16.mxu1 %v2954_v1 }
 0x28a   : > { %2829 = vmatprep.subr.bf16.mxu0 %v2954_v1 }
 0x28c   : > { %2824 = vmatpush3.bf16.msra.mxu1 %v2922_v44  ;;  %v2592_v44 = vld [vmem:[%s3518_s16] ss:$0 sm:$0xff] }
 0x28d   : > { %2837 = vmatprep.subr.bf16.mxu1 %v2954_v1 }
 0x352   : > { %v1670_v45 = vpop.f32.mrb[32].mxu1 }
 0x353   : > { %v2799_v46 = vpop.f32.mrb[33].mxu1 }
 0x354   : > { %v1673_v47 = vpop.f32.mrb[34].mxu1 }
 0x355   : > { %v2800_v48 = vpop.f32.mrb[35].mxu1 }
 0x357   : > { %v1720_v49 = vpop.f32.mrb[24].mxu0 }
 0x358   : > { %v1721_v50 = vadd.f32 %v1720_v49, %v1670_v45  ;;  %v2805_v51 = vpop.f32.mrb[25].mxu0 }
 0x359   : > { %v1723_v53 = vpop.f32.mrb[26].mxu0 }
 0x35a   : > { %v1724_v55 = vadd.f32 %v1723_v53, %v1673_v47  ;;  %v2806_v56 = vpop.f32.mrb[27].mxu0  ;;  %v1774_v57 = vpop.f32.mrb[36].mxu1 }
 0x35b   : > { %v1781_v59 = vadd.f32 %v1774_v57, %v1721_v50  ;;  %v2811_v60 = vpop.f32.mrb[37].mxu1  ;;  %v2931_v57 = vld [vmem:[%s3519_s17 + $0x40] sm:$0xff]  }
 0x35c   : > { %v1777_v61 = vpop.f32.mrb[38].mxu1 }
 0x35d   : > { %v1790_v62 = vadd.f32 %v2574_v58, %v1781_v59  ;;  %v1782_v63 = vadd.f32 %v1777_v61, %v1724_v55  ;;  %v2812_v0 = vpop.f32.mrb[39].mxu1 }
 0x35f   : > { %v1792_v2 = vmax.f32 %v1790_v62, 0.0  ;;  %v1791_v3 = vadd.f32 %v2574_v58, %v1782_v63 }
 0x361   : > { %v1793_v4 = vmax.f32 %v1791_v3, 0.0  ;;  %v1794_v5 = vrot.slane %v1792_v2, 7  ;;  %v1800_v7 = vrot.slane %v1792_v2, 1 }
 0x363   : > { %v1795_v8 = vrot.slane %v1793_v4, 7  ;;  %v1801_v9 = vrot.slane %v1793_v4, 1  ;;  %v1811_v10 = vpack.c.bf16 %v1793_v4, %v1792_v2 }
 0x365   : > { %v1796_v11 = vsel %vm914_vm9, %v1794_v5, %v1795_v8  ;;  %v1797_v12 = vsel %vm914_vm9, %v1795_v8, %v1794_v5  ;;  %v1802_v13 = vsel %vm931_vm11, %v1800_v7, %v1801_v9  ;;  %v1803_v14 = vsel %vm931_vm11, %v1801_v9, %v1800_v7  ;;  %2818 = vmatmul.mubr.msk.bf16.vlgmr.msra.gmra.mrb[28].mxu0 %vm1829_vm15, %v1811_v10  ;;  %v2933_v7 = vld [vmem:[%s3519_s17 + $0x48] sm:$0xff]   ;;  %v2935_v8 = vld [vmem:[%s3519_s17 + $0x58] sm:$0xff]   ;;  %v2938_v9 = vld [vmem:[%s3521_s19 + $0x10] sm:$0xff]  }
 0x366   : > { %v1798_v15 = vmul.f32 %v1797_v12, %v3150_v40  ;;  %v1799_v16 = vmul.f32 %v1796_v11, %v3152_v41  ;;  %v1804_v17 = vmul.f32 %v1802_v13, %v3171_v52  ;;  %v1805_v18 = vmul.f32 %v1803_v14, %v3175_v54  ;;  %2830 = vmatpush3.bf16.msra.mxu0 %v2921_v6  ;;  %v2939_v10 = vld [vmem:[%s3521_s19 + $0x18] sm:$0xff]   ;;  %v2940_v11 = vld [vmem:[%s3521_s19 + $0x20] sm:$0xff]   ;;  %v2941_v12 = vld [vmem:[%s3521_s19 + $0x28] sm:$0xff]  }
 0x367   : > { %2831 = vmatprep.subr.bf16.mxu0 %v2954_v1  ;;  %2833 = vmatprep.mubr.msk.bf16.mxu0 %vm2956_vm2, %v2954_v1  ;;  %v2942_v13 = vld [vmem:[%s3521_s19 + $0x30] sm:$0xff]   ;;  %v2943_v14 = vld [vmem:[%s3521_s19 + $0x38] sm:$0xff]  }
 0x368   : > { %v1806_v20 = vpack.c.bf16 %v1799_v16, %v1798_v15  ;;  %v1930_v21 = vpack.c.bf16 %v1805_v18, %v1804_v17 }
 0x36a   : > { %2832 = vmatpush3.bf16.msra.mxu0 %v2923_v19  ;;  %2826 = vmatmul.mubr.msk.bf16.vlgmr.msra.gmra.mrb[40].mxu1 %vm1829_vm15, %v1806_v20 }
 0x36b   : > { %2849 = vmatprep.subr.bf16.mxu0 %v2954_v1  ;;  %2845 = vmatprep.mubr.msk.bf16.mxu1 %vm2956_vm2, %v2954_v1 }
 0x36c   : > { %2838 = vmatpush3.bf16.msra.mxu1 %v2924_v22 }
 0x36d   : > { %2834 = vmatmul.mubr.msk.bf16.vlgmr.msra.gmra.mrb[32].mxu0 %vm1829_vm15, %v1930_v21  ;;  %2839 = vmatprep.subr.bf16.mxu1 %v2954_v1 }
 0x36e   : > { %2857 = vmatprep.mubr.msk.bf16.mxu0 %vm2956_vm2, %v2954_v1  ;;  %2850 = vmatpush3.bf16.msra.mxu0 %v2926_v24 }
 0x36f   : > { %2851 = vmatprep.subr.bf16.mxu0 %v2954_v1 }
 0x370   : > { %2840 = vmatpush3.bf16.msra.mxu1 %v2925_v23 }
 0x371   : > { %2841 = vmatprep.subr.bf16.mxu1 %v2954_v1 }
 0x372   : > { %2852 = vmatpush3.bf16.msra.mxu0 %v2928_v26 }
 0x373   : > { %2853 = vmatprep.subr.bf16.mxu0 %v2954_v1 }
 0x374   : > { %2842 = vmatpush3.bf16.msra.mxu1 %v2927_v25 }
 0x375   : > { %2843 = vmatprep.subr.bf16.mxu1 %v2954_v1 }
 0x376   : > { %2854 = vmatpush3.bf16.msra.mxu0 %v2930_v28 }
 0x377   : > { %2855 = vmatprep.subr.bf16.mxu0 %v2954_v1 }
 0x378   : > { %2844 = vmatpush3.bf16.msra.mxu1 %v2929_v27 }
 0x379   : > { %2861 = vmatprep.subr.bf16.mxu1 %v2954_v1 }
 0x37a   : > { %2856 = vmatpush3.bf16.msra.mxu0 %v2932_v29 }
 0x37b   : > { %2873 = vmatprep.subr.bf16.mxu0 %v2954_v1 }
 0x438   : > { %v1867_v30 = vpop.f32.mrb[28].mxu0 }
 0x439   : > { %v2819_v31 = vpop.f32.mrb[29].mxu0 }
 0x43a   : > { %v1870_v32 = vpop.f32.mrb[30].mxu0 }
 0x43b   : > { %v2820_v33 = vpop.f32.mrb[31].mxu0 }
 0x43d   : > { %v1923_v35 = vpop.f32.mrb[40].mxu1 }
 0x43e   : > { %v1924_v36 = vadd.f32 %v1923_v35, %v1867_v30  ;;  %v2827_v37 = vpop.f32.mrb[41].mxu1 }
 0x43f   : > { %v1926_v38 = vpop.f32.mrb[42].mxu1  ;;  %v2944_v37 = vld [vmem:[%s3523_s21] sm:$0xff]  }
 0x440   : > { %v1927_v39 = vadd.f32 %v1926_v38, %v1870_v32  ;;  %v2828_v42 = vpop.f32.mrb[43].mxu1  ;;  %v1985_v43 = vpop.f32.mrb[32].mxu0  ;;  %v2625_v38 = vld [vmem:[%s3522_s20] ss:$0 sm:$0xff] }
 0x441   : > { %v1992_v45 = vadd.f32 %v1985_v43, %v1924_v36  ;;  %v2835_v46 = vpop.f32.mrb[33].mxu0 }
 0x442   : > { %v1988_v47 = vpop.f32.mrb[34].mxu0 }
 0x443   : > { %v2001_v48 = vadd.f32 %v2592_v44, %v1992_v45  ;;  %v1993_v49 = vadd.f32 %v1988_v47, %v1927_v39  ;;  %v2836_v50 = vpop.f32.mrb[35].mxu0 }
 0x444   : > { %v2634_v50 = vld [vmem:[%s3524_s22] ss:$0 sm:$0xff] }
 0x445   : > { %v2003_v51 = vmax.f32 %v2001_v48, 0.0  ;;  %v2002_v53 = vadd.f32 %v2592_v44, %v1993_v49 }
 0x447   : > { %v2004_v55 = vmax.f32 %v2002_v53, 0.0  ;;  %v2005_v56 = vrot.slane %v2003_v51, 7  ;;  %v2011_v58 = vrot.slane %v2003_v51, 1 }
 0x449   : > { %v2006_v59 = vrot.slane %v2004_v55, 7  ;;  %v2012_v60 = vrot.slane %v2004_v55, 1  ;;  %v2026_v61 = vpack.c.bf16 %v2004_v55, %v2003_v51 }
 0x44b   : > { %v2007_v62 = vsel %vm914_vm9, %v2005_v56, %v2006_v59  ;;  %v2008_v63 = vsel %vm914_vm9, %v2006_v59, %v2005_v56  ;;  %v2013_v0 = vsel %vm931_vm11, %v2011_v58, %v2012_v60  ;;  %v2014_v2 = vsel %vm931_vm11, %v2012_v60, %v2011_v58  ;;  %2846 = vmatmul.mubr.msk.bf16.vlgmr.msra.gmra.mrb[44].mxu1 %vm2060_vm0, %v2026_v61 }
 0x44c   : > { %v2009_v3 = vmul.f32 %v2008_v63, %v3150_v40  ;;  %v2010_v4 = vmul.f32 %v2007_v62, %v3152_v41  ;;  %v2015_v5 = vmul.f32 %v2013_v0, %v3171_v52  ;;  %v2016_v6 = vmul.f32 %v2014_v2, %v3175_v54  ;;  %2862 = vmatpush3.bf16.msra.mxu1 %v2931_v57  ;;  %v2934_v52 = vld [vmem:[%s3519_s17 + $0x50] sm:$0xff]   ;;  %v2937_v54 = vld [vmem:[%s3521_s19 + $0x8] sm:$0xff]  }
 0x44d   : > { %2863 = vmatprep.subr.bf16.mxu1 %v2954_v1  ;;  %2869 = vmatprep.mubr.msk.bf16.mxu1 %vm2956_vm2, %v2954_v1 }
 0x44e   : > { %v2017_v40 = vpack.c.bf16 %v2010_v4, %v2009_v3  ;;  %v2173_v41 = vpack.c.bf16 %v2016_v6, %v2015_v5 }
 0x450   : > { %2864 = vmatpush3.bf16.msra.mxu1 %v2933_v7  ;;  %2858 = vmatmul.mubr.msk.bf16.vlgmr.msra.gmra.mrb[36].mxu0 %vm2060_vm0, %v2017_v40 }
 0x451   : > { %2865 = vmatprep.subr.bf16.mxu1 %v2954_v1  ;;  %2874 = vmatpush3.bf16.msra.mxu0 %v2936_v34 }
 0x452   : > { %2875 = vmatprep.subr.bf16.mxu0 %v2954_v1  ;;  %2889 = vmatprep.mubr.msk.bf16.mxu0 %vm2956_vm2, %v2954_v1 }
 0x454   : > { %2866 = vmatpush3.bf16.msra.mxu1 %v2934_v52 }
 0x455   : > { %2867 = vmatprep.subr.bf16.mxu1 %v2954_v1  ;;  %2876 = vmatpush3.bf16.msra.mxu0 %v2937_v54 }
 0x456   : > { %2877 = vmatprep.subr.bf16.mxu0 %v2954_v1 }
 0x458   : > { %2868 = vmatpush3.bf16.msra.mxu1 %v2935_v8 }
 0x459   : > { %2893 = vmatprep.subr.bf16.mxu1 %v2954_v1  ;;  %2878 = vmatpush3.bf16.msra.mxu0 %v2938_v9 }
 0x45a   : > { %2879 = vmatprep.subr.bf16.mxu0 %v2954_v1 }
 0x45b   : > { %2870 = vmatmul.mubr.msk.bf16.vlgmr.msra.gmra.mrb[48].mxu1 %vm2060_vm0, %v2173_v41 }
 0x45c   : > { %2895 = vmatprep.mubr.msk.bf16.mxu1 %vm2956_vm2, %v2954_v1  ;;  %2894 = vmatpush3.bf16.msra.mxu1 %v2944_v37 }
 0x45d   : > { %2880 = vmatpush3.bf16.msra.mxu0 %v2939_v10 }
 0x45e   : > { %2881 = vmatprep.subr.bf16.mxu0 %v2954_v1 }
 0x461   : > { %2882 = vmatpush3.bf16.msra.mxu0 %v2940_v11 }
 0x462   : > { %2883 = vmatprep.subr.bf16.mxu0 %v2954_v1 }
 0x465   : > { %2884 = vmatpush3.bf16.msra.mxu0 %v2941_v12 }
 0x466   : > { %2885 = vmatprep.subr.bf16.mxu0 %v2954_v1 }
 0x469   : > { %2886 = vmatpush3.bf16.msra.mxu0 %v2942_v13 }
 0x46a   : > { %2887 = vmatprep.subr.bf16.mxu0 %v2954_v1  ;;  %v2624_v1 = vld [vmem:[%s3520_s18] ss:$0 sm:$0xff] }
 0x46d   : > { %2888 = vmatpush3.bf16.msra.mxu0 %v2943_v14 }
 0x51e   : > { %v2098_v15 = vpop.f32.mrb[44].mxu1 }
 0x51f   : > { %v2847_v16 = vpop.f32.mrb[45].mxu1 }
 0x520   : > { %v2101_v17 = vpop.f32.mrb[46].mxu1 }
 0x521   : > { %v2848_v18 = vpop.f32.mrb[47].mxu1 }
 0x523   : > { %v2166_v19 = vpop.f32.mrb[36].mxu0 }
 0x524   : > { %v2167_v20 = vadd.f32 %v2166_v19, %v2098_v15  ;;  %v2859_v21 = vpop.f32.mrb[37].mxu0 }
 0x525   : > { %v2169_v22 = vpop.f32.mrb[38].mxu0 }
 0x526   : > { %v2170_v23 = vadd.f32 %v2169_v22, %v2101_v17  ;;  %v2860_v24 = vpop.f32.mrb[39].mxu0 }
 0x52e   : > { %v2244_v25 = vpop.f32.mrb[48].mxu1 }
 0x52f   : > { %v2251_v26 = vadd.f32 %v2244_v25, %v2167_v20  ;;  %v2871_v27 = vpop.f32.mrb[49].mxu1 }
 0x530   : > { %v2247_v28 = vpop.f32.mrb[50].mxu1 }
 0x531   : > { %v2260_v29 = vadd.f32 %v2624_v1, %v2251_v26  ;;  %v2252_v30 = vadd.f32 %v2247_v28, %v2170_v23  ;;  %v2872_v31 = vpop.f32.mrb[51].mxu1 }
 0x533   : > { %v2261_v32 = vadd.f32 %v2624_v1, %v2252_v30  ;;  %v2262_v33 = vmax.f32 %v2260_v29, 0.0 }
 0x535   : > { %v2263_v35 = vmax.f32 %v2261_v32, 0.0 }
 0x537   : > { %v2264_v36 = vpack.c.bf16 %v2263_v35, %v2262_v33 }
 0x539   : > { %2890 = vmatmul.mubr.bf16.vlgmr.msra.gmra.mrb[40].mxu0 %v2264_v36 }
 0x60c   : > { %v2370_v39 = vpop.f32.mrb[40].mxu0 }
 0x60d   : > { %v2371_v42 = vadd.f32 %v2625_v38, %v2370_v39  ;;  %v2891_v43 = vpop.f32.mrb[41].mxu0 }
 0x60e   : > { %v2373_v44 = vpop.f32.mrb[42].mxu0 }
 0x60f   : > { %v2374_v45 = vadd.f32 %v2625_v38, %v2373_v44  ;;  %v2892_v46 = vpop.f32.mrb[43].mxu0  ;;  %v2377_v47 = vmax.f32 %v2371_v42, 0.0 }
 0x611   : > { %v2378_v48 = vmax.f32 %v2374_v45, 0.0 }
 0x613   : > { %v2379_v49 = vpack.c.bf16 %v2378_v48, %v2377_v47 }
 0x615   : > { %2896 = vmatmul.mubr.msk.bf16.vlgmr.msra.gmra.mrb[52].mxu1 %vm1632_vm14, %v2379_v49 }
 0x6e8   : > { %v2432_v51 = vpop.f32.mrb[52].mxu1 }
 0x6e9   : > { %v2433_v53 = vadd.f32 %v2634_v50, %v2432_v51  ;;  %v2897_v55 = vpop.f32.mrb[53].mxu1 }
 0x6ea   : > { %v2435_v56 = vpop.f32.mrb[54].mxu1 }
 0x6eb   : > { %2439 = vst [vmem:[%s756_s29] sm:$0xff] %v2433_v53  ;;  %v2436_v57 = vadd.f32 %v2634_v50, %v2435_v56  ;;  %v2898_v58 = vpop.f32.mrb[55].mxu1 }
 0x6ed   : > { %2440 = vst [vmem:[%s756_s29 + $0x8] sm:$0xff] %v2436_v57 }
 0x6ee PF: > { %s33_s4 = sadd.s32 1, %s2951_s4  }
 0x6ef   : > { %p30_p4 = scmp.ge.s32.totalorder %s33_s4, 6  }
 0x6f1   :  { %32 = sbr.rel (!%p30_p4) target bundleno = 9 (0x9), region = 162 }

</bundles_post_ra>
